<compile_context>
chip_gen: v6e
topology: v6e:2x2x1
jax: 0.10.0
libtpu: 0.0.40
codegen_flags: <defaults>
</compile_context>

<pallas_src>
import math
import functools

import jax
import jax.numpy as jnp
from jax.experimental import pallas as pl
from jax.experimental.pallas import tpu as pltpu


# ----------------------------------------------------------------------------
# Trace-time (host Python) nearest-index math — matches PyTorch exactly.
# ----------------------------------------------------------------------------
def _axis_out_and_scale(in_size, size, scale_factor):
    if size is not None:
        out_size = int(size)
        scale_eff = in_size / out_size
    else:
        out_size = int(math.floor(in_size * float(scale_factor)))
        scale_eff = 1.0 / float(scale_factor)
    return out_size, scale_eff


def _src_indices(in_size, out_size, scale_eff):
    return [min(int(math.floor(d * scale_eff)), in_size - 1) for d in range(out_size)]


def _segments(indices):
    """Group consecutive equal source indices -> ((src, run_len), ...)."""
    segs = []
    for idx in indices:
        if segs and segs[-1][0] == idx:
            segs[-1][1] += 1
        else:
            segs.append([idx, 1])
    return tuple((s, n) for s, n in segs)


def _uniform_upsample_rate(in_size, src):
    """Return r if src == [d // r] with len(src) == r * in_size (r may be 1), else None."""
    out_size = len(src)
    if out_size % in_size != 0:
        return None
    r = out_size // in_size
    if all(src[d] == d // r for d in range(out_size)):
        return r
    return None


def _make_w_plan(in_size, src):
    """Trace-time plan for the W (sublane-axis) resample."""
    out_size = len(src)
    if out_size == in_size and all(src[d] == d for d in range(out_size)):
        return ("identity",)
    r = _uniform_upsample_rate(in_size, src)
    if r is not None:
        return ("repeat", r)                               # integer upsample (FPN x2 path)
    if out_size == 1:
        return ("stride", src[0], 1)
    step = src[1] - src[0]
    if step >= 1 and all(src[d] == src[0] + d * step for d in range(out_size)):
        return ("stride", src[0], step)                    # integer downsample
    return ("segments", _segments(src))                    # general fallback


def _largest_divisor_le(n, cap):
    cap = max(1, min(n, cap))
    for d in range(cap, 0, -1):
        if n % d == 0:
            return d
    return 1


# ----------------------------------------------------------------------------
# In-kernel W-axis resample on a channel-last (rows, W_in, C) VMEM view.
# ----------------------------------------------------------------------------
def _resample_w(x_ref, w_plan, w_out):
    kind = w_plan[0]
    if kind == "stride":
        start, step = w_plan[1], w_plan[2]
        if step == 1:
            return x_ref[:, pl.ds(start, w_out), :]
        # Integer-stride downsample: one addressed (strided) sublane load,
        # not W_out separate extracts.
        return x_ref[:, pl.ds(start, w_out, stride=step), :]
    x = x_ref[...]                                          # (rows, W_in, C)
    rows, _, c = x.shape
    if kind == "identity":
        return x
    if kind == "repeat":
        # Integer upsample: single sublane interleave (broadcast + reshape), O(1) ops.
        return jnp.repeat(x, w_plan[1], axis=1)
    # General fallback (fractional scales): one whole-vreg sublane broadcast per run,
    # assembled with a single concatenate. C stays on lanes -> no cross-lane work.
    segs = w_plan[1]
    return jnp.concatenate(
        [jnp.broadcast_to(x[:, w:w + 1, :], (rows, n, c)) for w, n in segs], axis=1)


# ----------------------------------------------------------------------------
# Kernels.
# ----------------------------------------------------------------------------
def _uniform_h_kernel(x_ref, o_ref, *, rh, w_plan, w_out):
    """Uniform integer H-upsample path. x_ref: (th, W_in, C); o_ref: (th*rh, W_out, C)."""
    rows = _resample_w(x_ref, w_plan, w_out)                # (th, W_out, C)
    if rh > 1:
        # Leading-dim replication: broadcast + leading-dim reshape (no relayout).
        rows = jnp.repeat(rows, rh, axis=0)                 # (th*rh, W_out, C)
    o_ref[...] = rows.astype(o_ref.dtype)


def _gather_h_kernel(h_src_ref, x_ref, o_ref, *, w_plan, w_out):
    """General H path. Source row already selected by the index_map (DMA addressing)."""
    del h_src_ref                                           # consumed by the index_maps only
    rows = _resample_w(x_ref, w_plan, w_out)                # (1, W_out, C)
    o_ref[...] = rows.astype(o_ref.dtype)


# ----------------------------------------------------------------------------
# Wrapper.
# ----------------------------------------------------------------------------
_TILE_BYTES = 2 * 1024 * 1024   # per-step (input + output) row-tile budget; x2 when
                                # double-buffered -> comfortably inside v5e/v6e/v7x VMEM.


def interpolate2d_nearest(x, *, size=None, scale_factor=None):
    """Pallas-backed F.interpolate(x, size, scale_factor, mode='nearest') for NCHW x."""
    assert x.ndim == 4, "expected a 4-D NCHW tensor"
    assert (size is None) != (scale_factor is None), \
        "give exactly one of `size` / `scale_factor`"
    N, C, H, W = x.shape

    if size is not None:
        size_h, size_w = size if isinstance(size, (tuple, list)) else (size, size)
        sf_h = sf_w = None
    else:
        size_h = size_w = None
        sf_h, sf_w = (scale_factor if isinstance(scale_factor, (tuple, list))
                      else (scale_factor, scale_factor))

    H_out, scale_h = _axis_out_and_scale(H, size_h, sf_h)
    W_out, scale_w = _axis_out_and_scale(W, size_w, sf_w)
    assert H_out > 0 and W_out > 0, "empty output size"

    h_src = _src_indices(H, H_out, scale_h)
    w_src = _src_indices(W, W_out, scale_w)
    w_plan = _make_w_plan(W, w_src)
    rh = _uniform_upsample_rate(H, h_src)

    # Lane-dense, channel-last layout for the kernel (layout plumbing, not compute).
    x_nhwc = jnp.transpose(x, (0, 2, 3, 1))                 # (N, H, W, C)

    itemsize = jnp.dtype(x.dtype).itemsize
    cost = pl.CostEstimate(
        flops=0, transcendentals=0,
        bytes_accessed=(N * C * H * W + N * C * H_out * W_out) * itemsize)
    params = pltpu.CompilerParams(dimension_semantics=("parallel", "parallel"))

    if rh is not None:
        # Fast path (giraffe_fpn x2 upsample, identity-H, any integer-H upsample):
        # grid tiles input rows; H replication is pure block indexing + one in-kernel
        # leading-dim repeat. Tile sized to the VMEM budget.
        bytes_per_in_row = W * C * itemsize
        bytes_per_out_rows = rh * W_out * C * itemsize
        max_rows = max(1, _TILE_BYTES // max(1, bytes_per_in_row + bytes_per_out_rows))
        th = _largest_divisor_le(H, max_rows)
        out_nhwc = pl.pallas_call(
            functools.partial(_uniform_h_kernel, rh=rh, w_plan=w_plan, w_out=W_out),
            out_shape=jax.ShapeDtypeStruct((N, H_out, W_out, C), x.dtype),
            grid_spec=pltpu.PrefetchScalarGridSpec(
                num_scalar_prefetch=0,
                grid=(N, H // th),
                in_specs=[pl.BlockSpec((None, th, W, C), lambda n, t: (n, t, 0, 0))],
                out_specs=pl.BlockSpec((None, th * rh, W_out, C),
                                       lambda n, t: (n, t, 0, 0))),
            compiler_params=params,
            cost_estimate=cost,
        )(x_nhwc)
    else:
        # General path (downsampled / fractional H): per-output-row grid; the source row
        # comes from a scalar-prefetched int32 table read inside the input index_map, so
        # the H gather is done by the pipeline's DMA addressing, not by compute.
        h_src_arr = jnp.asarray(h_src, dtype=jnp.int32)
        out_nhwc = pl.pallas_call(
            functools.partial(_gather_h_kernel, w_plan=w_plan, w_out=W_out),
            out_shape=jax.ShapeDtypeStruct((N, H_out, W_out, C), x.dtype),
            grid_spec=pltpu.PrefetchScalarGridSpec(
                num_scalar_prefetch=1,
                grid=(N, H_out),
                in_specs=[pl.BlockSpec((None, 1, W, C),
                                       lambda n, h, h_src_ref: (n, h_src_ref[h], 0, 0))],
                out_specs=pl.BlockSpec((None, 1, W_out, C),
                                       lambda n, h, h_src_ref: (n, h, 0, 0))),
            compiler_params=params,
            cost_estimate=cost,
        )(h_src_arr, x_nhwc)

    return jnp.transpose(out_nhwc, (0, 3, 1, 2))            # back to NCHW


# ----------------------------------------------------------------------------
# Module-style wrapper mirroring the PyTorch Interpolate2d interface.
# ----------------------------------------------------------------------------
class Interpolate2d:
    def __init__(self, size=None, scale_factor=None, mode='nearest', align_corners=False):
        if mode != 'nearest':
            raise NotImplementedError(
                "TODO(synk): only mode='nearest' is implemented in the Pallas version")
        self.name = type(self).__name__
        self.size = size
        if isinstance(scale_factor, tuple):
            self.scale_factor = tuple(float(f) for f in scale_factor)
        else:
            # (fixed vs. the original: do not silently drop scale_factor=0.0)
            self.scale_factor = float(scale_factor) if scale_factor is not None else None
        self.mode = mode
        self.align_corners = None  # nearest mode

    def __call__(self, x):
        return interpolate2d_nearest(x, size=self.size, scale_factor=self.scale_factor)


# ----------------------------------------------------------------------------
if __name__ == "__main__":
    key = jax.random.PRNGKey(0)
    x = jax.random.normal(key, (2, 4, 16, 16), jnp.float32)   # NCHW, PyTorch layout

    # 1) giraffe_fpn use case: nearest x2 upsample via scale_factor (uniform-H + W-repeat)
    y = Interpolate2d(scale_factor=2.0, mode='nearest')(x)
    jax.block_until_ready(y)
    assert y.shape == (2, 4, 32, 32), y.shape
    ref = jnp.repeat(jnp.repeat(x, 2, axis=2), 2, axis=3)
    assert bool(jnp.all(y == ref)), "scale_factor=2 nearest mismatch"

    # 2) size path: H upsampled x2, W downsampled x2 (uniform-H grid + strided-W load)
    y2 = Interpolate2d(size=(32, 8), mode='nearest')(x)
    jax.block_until_ready(y2)
    assert y2.shape == (2, 4, 32, 8), y2.shape
    ref2 = jnp.repeat(x, 2, axis=2)[:, :, :, ::2]
    assert bool(jnp.all(y2 == ref2)), "size=(32,8) nearest mismatch"

    # 3) fractional scale: exercises the scalar-prefetch H-gather grid + W segment fallback
    y3 = Interpolate2d(scale_factor=1.5, mode='nearest')(x)
    jax.block_until_ready(y3)
    assert y3.shape == (2, 4, 24, 24), y3.shape
    # PyTorch formula: src = floor(d * (1/scale_factor)), clamped.
    idx = jnp.asarray([min(int(math.floor(d * (1.0 / 1.5))), 15) for d in range(24)],
                      dtype=jnp.int32)
    ref3 = x[:, :, idx, :][:, :, :, idx]
    assert bool(jnp.all(y3 == ref3)), "scale_factor=1.5 nearest mismatch"

    print("KERNEL_OK")
</pallas_src>

<mosaic_0001>
module attributes {stable_mosaic.version = 11 : i64} {
  func.func @_uniform_h_kernel(%arg0: i32, %arg1: i32, %arg2: memref<1x16x16x4xf32, #tpu.memory_space<vmem>>, %arg3: memref<1x32x32x4xf32, #tpu.memory_space<vmem>>) attributes {dimension_semantics = [#tpu.dimension_semantics<parallel>, #tpu.dimension_semantics<parallel>], iteration_bounds = array<i64: 2, 1>, scalar_prefetch = 0 : i64, scratch_operands = 0 : i64, tpu.core_type = #tpu.core_type<tc>, window_params = [{transform_indices = @transform_0, window_bounds = array<i64: 1, 16, 16, 4>}, {transform_indices = @transform_1, window_bounds = array<i64: 1, 32, 32, 4>}]} {
    %c0 = arith.constant 0 : index
    %c0_0 = arith.constant 0 : index
    %c0_1 = arith.constant 0 : index
    %c0_2 = arith.constant 0 : index
    %0 = vector.load %arg2[%c0, %c0_0, %c0_1, %c0_2] : memref<1x16x16x4xf32, #tpu.memory_space<vmem>>, vector<1x16x16x4xf32>
    %1 = vector.shape_cast %0 : vector<1x16x16x4xf32> to vector<16x16x4xf32>
    %2 = vector.shape_cast %1 : vector<16x16x4xf32> to vector<16x16x1x4xf32>
    %3 = vector.broadcast %2 : vector<16x16x1x4xf32> to vector<16x16x2x4xf32>
    %4 = vector.shape_cast %3 : vector<16x16x2x4xf32> to vector<16x32x4xf32>
    %5 = vector.shape_cast %4 : vector<16x32x4xf32> to vector<16x1x32x4xf32>
    %6 = vector.broadcast %5 : vector<16x1x32x4xf32> to vector<16x2x32x4xf32>
    %7 = vector.shape_cast %6 : vector<16x2x32x4xf32> to vector<32x32x4xf32>
    %c0_3 = arith.constant 0 : index
    %c0_4 = arith.constant 0 : index
    %c0_5 = arith.constant 0 : index
    %c0_6 = arith.constant 0 : index
    %8 = vector.load %arg3[%c0_3, %c0_4, %c0_5, %c0_6] : memref<1x32x32x4xf32, #tpu.memory_space<vmem>>, vector<1x32x32x4xf32>
    %9 = vector.shape_cast %8 : vector<1x32x32x4xf32> to vector<32x32x4xf32>
    %10 = vector.shape_cast %7 : vector<32x32x4xf32> to vector<1x32x32x4xf32>
    tpu.vector_store %arg3[%c0_3, %c0_4, %c0_5, %c0_6], %10 {strides = array<i32>} : memref<1x32x32x4xf32, #tpu.memory_space<vmem>>, vector<1x32x32x4xf32>,
    return
  }
  func.func @transform_0(%arg0: i32, %arg1: i32) -> (i32, i32, i32, i32) {
    %c0_i32 = arith.constant 0 : i32
    %c0_i32_0 = arith.constant 0 : i32
    %c0_i32_1 = arith.constant 0 : i32
    return %arg0, %arg1, %c0_i32, %c0_i32_0 : i32, i32, i32, i32
  }
  func.func @transform_1(%arg0: i32, %arg1: i32) -> (i32, i32, i32, i32) {
    %c0_i32 = arith.constant 0 : i32
    %c0_i32_0 = arith.constant 0 : i32
    %c0_i32_1 = arith.constant 0 : i32
    return %arg0, %arg1, %c0_i32, %c0_i32_0 : i32, i32, i32, i32
  }
}

</mosaic_0001>

<bundles_post_ra>
// kernel: tpu_custom_call.1
= control target key start
LH: loop header
LB: loop body
LE: loop exit
PB: predicated region body
PF: predicated region fallthrough
CT: control target
= control target key end

     0   :  { %s4269_s6 = smov 0   ;;  %s4271_s7 = smov 0   ;;  %s5206_s0 = inlined_call_operand.vmem [shape: f32[2,16,16,4], index: 0, kind: input, shape index: {}]   ;;  %s5207_s1 = inlined_call_operand.vmem [shape: f32[2,32,32,4], index: 1, kind: output, shape index: {}]  }
   0x1   :  { %s4273_s8 = smov 0  }
   0x2 LB: > { %s23_s9 = sadd.s32 1, %s4251_s7  ;;  %p4198_p0 = scmp.ge.s32.totalorder %s4255_s8, 1  ;;  %s4255_s8 = sphi %s4273_s8, %s11_s8   ;;  %s4251_s7 = sphi %s4271_s7, %s5209_s7   ;;  %s4247_s6 = sphi %s4269_s6, %s5208_s6  }
   0x3   : > { %p25_p1 = scmp.ge.s32.totalorder %s23_s9, 2  ;;  %p109_p2 = scmp.lt.s32.totalorder %s4255_s8, 3 }
   0x5   : > { %s5211_s9 = smov (%p25_p1, %s23_s9), 0  ;;  %p110_p3 = pnand %p4198_p0, %p109_p2 }
   0x6   : > { %p140_p4 = scmp.lt.s32.totalorder (!%p110_p3), %s4247_s6, 1 }
   0x7   : > { %113 = sbr.rel (%p110_p3) target bundleno = 290 (0x122), region = 24 }
   0xc   : > { %v229_v0 = vlaneseq  ;;  %v4257_v1 = vmov 1966171168   ;;  %v4258_v3 = vmov 1983009808   ;;  %s5213_s6 = smov (!%p140_p4, %s4247_s6), 1  ;;  %vm3969_vm0 = vcmask 31744  }
   0xd   : > { %v227_v2 = vunpack.c.l.s4 %v4257_v1  ;;  %v2820_v4 = vunpack.c.l.s4 %v4258_v3  ;;  %s4205_s10 = sshll.u32 %s5213_s6, 8  ;;  %s4206_s14 = sshll.u32 %s5213_s6, 10 }
   0xe   : > { %v230_v5 = vshrl.u32 %v229_v0, 7  ;;  %s4293_s13 = scalar_lea.vmem %s5206_s0, %s4205_s10  ;;  %s4354_s17 = scalar_lea.vmem %s5207_s1, %s4206_s14 }
   0xf   : > { %v228_v6 = vunpack.c.0.s8 %v227_v2  ;;  %v2821_v7 = vunpack.c.0.s8 %v2820_v4  ;;  %v161_v9 = vld [vmem:[%s4293_s13] sm:$0xff]  ;;  %v162_v12 = vld [vmem:[%s4293_s13 + $0x8] sm:$0xff]  ;;  %v4304_v13 = vld [vmem:[%s4293_s13 + $0x10] sm:$0xff] }
  0x10   : > { %v4298_v10 = vsub.s32 0, %v230_v5  ;;  %v225_v15 = vcombine.high %v161_v9, %v161_v9  ;;  %v274_v17 = vcombine.high %v162_v12, %v162_v12  ;;  %v4309_v18 = vld [vmem:[%s4293_s13 + $0x18] sm:$0xff]  ;;  %v323_v20 = vcombine.high %v4304_v13, %v4304_v13 }
  0x11   : > { %v4295_v8 = vsub.s32 %v228_v6, %v230_v5  ;;  %v4300_v11 = vsub.s32 %v2821_v7, %v230_v5  ;;  %v372_v22 = vcombine.high %v4309_v18, %v4309_v18 }
  0x13   : > { %v232_v14 = vrot.slane %v161_v9, %v4295_v8  ;;  %v281_v16 = vrot.slane %v162_v12, %v4295_v8  ;;  %v330_v19 = vrot.slane %v4304_v13, %v4295_v8  ;;  %v4317_v21 = vrot.slane %v4309_v18, %v4295_v8 }
  0x14   : > { %v239_v25 = vrot.slane %v225_v15, %v4295_v8  ;;  %v288_v28 = vrot.slane %v274_v17, %v4295_v8 }
  0x15   : > { %v240_v23 = vcombine.high %v232_v14, %v232_v14  ;;  %v248_v24 = vrot.slane %v232_v14, %v4295_v8  ;;  %v289_v26 = vcombine.high %v281_v16, %v281_v16  ;;  %v297_v27 = vrot.slane %v281_v16, %v4295_v8 }
  0x16   : > { %v338_v29 = vcombine.high %v330_v19, %v330_v19  ;;  %v4326_v30 = vrot.slane %v330_v19, %v4295_v8  ;;  %v241_v34 = vcombine.high %v239_v25, %v239_v25  ;;  %v255_v35 = vrot.slane %v239_v25, %v4295_v8 }
  0x17   : > { %v262_v31 = vrot.slane %v240_v23, %v4295_v8  ;;  %v270_v32 = vcombine.high %v248_v24, %v248_v24  ;;  %v1796_v33 = vrot.slane %v248_v24, %v4298_v10  ;;  %v311_v36 = vrot.slane %v289_v26, %v4295_v8 }
  0x18   : > { %v319_v37 = vcombine.high %v297_v27, %v297_v27  ;;  %v1828_v38 = vrot.slane %v297_v27, %v4298_v10  ;;  %v269_v42 = vrot.slane %v241_v34, %v4295_v8  ;;  %v271_v43 = vcombine.high %v255_v35, %v255_v35 }
  0x19   : > { %v272_v39 = vcombine.high %v262_v31, %v262_v31  ;;  %v1800_v40 = vrot.slane %v262_v31, %v4298_v10  ;;  %v1804_v41 = vrot.slane %v270_v32, %v4298_v10  ;;  %v1812_v44 = vrot.slane %v255_v35, %v4298_v10 }
  0x1a   : > { %v321_v45 = vcombine.high %v311_v36, %v311_v36  ;;  %v1832_v46 = vrot.slane %v311_v36, %v4298_v10  ;;  %v273_v49 = vcombine.high %v269_v42, %v269_v42  ;;  %v1816_v50 = vrot.slane %v269_v42, %v4298_v10 }
  0x1b   : > { %v1808_v47 = vrot.slane %v272_v39, %v4298_v10  ;;  %v2817_v48 = vcombine.low %v1796_v33, %v1800_v40  ;;  %v1820_v51 = vrot.slane %v271_v43, %v4298_v10  ;;  %v1836_v52 = vrot.slane %v319_v37, %v4298_v10 }
  0x1c   : > { %v1840_v53 = vrot.slane %v321_v45, %v4298_v10  ;;  %v2851_v54 = vcombine.low %v1828_v38, %v1832_v46  ;;  %v1824_v57 = vrot.slane %v273_v49, %v4298_v10  ;;  %v2834_v58 = vcombine.low %v1812_v44, %v1816_v50  ;;  %v165_v50 = vld [vmem:[%s4293_s13 + $0x20] sm:$0xff] }
  0x1d   : > { %v2818_v55 = vcombine.low %v1804_v41, %v1808_v47  ;;  %v2825_v56 = vrot.slane %v2817_v48, %v4300_v11  ;;  %v290_v61 = vcombine.high %v288_v28, %v288_v28  ;;  %v304_v62 = vrot.slane %v288_v28, %v4295_v8 }
  0x1e   : > { %v2852_v59 = vcombine.low %v1836_v52, %v1840_v53  ;;  %v2859_v60 = vrot.slane %v2851_v54, %v4300_v11  ;;  %v2835_v0 = vcombine.low %v1820_v51, %v1824_v57  ;;  %v2842_v1 = vrot.slane %v2834_v58, %v4300_v11 }
  0x1f   : > { %v2832_v63 = vrot.slane %v2818_v55, %v4300_v11  ;;  %v360_v2 = vrot.slane %v338_v29, %v4295_v8  ;;  %v318_v4 = vrot.slane %v290_v61, %v4295_v8  ;;  %v320_v5 = vcombine.high %v304_v62, %v304_v62 }
  0x20   : > { %v2866_v3 = vrot.slane %v2852_v59, %v4300_v11  ;;  %v1844_v6 = vrot.slane %v304_v62, %v4298_v10  ;;  %v2849_v9 = vrot.slane %v2835_v0, %v4300_v11  ;;  %v368_v12 = vcombine.high %v4326_v30, %v4326_v30 }
  0x21   : > { %v2833_v7 = vcombine.low %v2825_v56, %v2832_v63  ;;  %v370_v14 = vcombine.high %v360_v2, %v360_v2  ;;  %v322_v16 = vcombine.high %v318_v4, %v318_v4  ;;  %v1848_v17 = vrot.slane %v318_v4, %v4298_v10 }
  0x22   : > { %v2867_v15 = vcombine.low %v2859_v60, %v2866_v3  ;;  %v1852_v19 = vrot.slane %v320_v5, %v4298_v10  ;;  %v2850_v23 = vcombine.low %v2842_v1, %v2849_v9  ;;  %v1860_v24 = vrot.slane %v4326_v30, %v4298_v10 }
  0x23   : > { %3970 = vst.msk [vmem:[%s4354_s17] sm:$0xff] %vm3969_vm0, %v2833_v7  ;;  %3974 = vst.msk [vmem:[%s4354_s17 + $0x20] sm:$0xff] %vm3969_vm0, %v2833_v7  ;;  %v1864_v25 = vrot.slane %v360_v2, %v4298_v10  ;;  %v1868_v26 = vrot.slane %v368_v12, %v4298_v10  ;;  %v1856_v27 = vrot.slane %v322_v16, %v4298_v10 }
  0x24   : > { %3972 = vst.msk [vmem:[%s4354_s17 + $0x10] sm:$0xff] %vm3969_vm0, %v2867_v15  ;;  %3976 = vst.msk [vmem:[%s4354_s17 + $0x30] sm:$0xff] %vm3969_vm0, %v2867_v15  ;;  %v2868_v28 = vcombine.low %v1844_v6, %v1848_v17  ;;  %v1872_v29 = vrot.slane %v370_v14, %v4298_v10  ;;  %v337_v31 = vrot.slane %v323_v20, %v4295_v8 }
  0x25   : > { %3971 = vst.msk [vmem:[%s4354_s17 + $0x8] sm:$0xff] %vm3969_vm0, %v2850_v23  ;;  %3975 = vst.msk [vmem:[%s4354_s17 + $0x28] sm:$0xff] %vm3969_vm0, %v2850_v23  ;;  %v2885_v30 = vcombine.low %v1860_v24, %v1864_v25  ;;  %v387_v32 = vcombine.high %v4317_v21, %v4317_v21  ;;  %v395_v33 = vrot.slane %v4317_v21, %v4295_v8 }
  0x26   : > { %v386_v34 = vrot.slane %v372_v22, %v4295_v8  ;;  %v2869_v35 = vcombine.low %v1852_v19, %v1856_v27  ;;  %v2876_v13 = vrot.slane %v2868_v28, %v4300_v11  ;;  %v2886_v20 = vcombine.low %v1868_v26, %v1872_v29  ;;  %v166_v27 = vld [vmem:[%s4293_s13 + $0x28] sm:$0xff] }
  0x27   : > { %v339_v36 = vcombine.high %v337_v31, %v337_v31  ;;  %v2893_v37 = vrot.slane %v2885_v30, %v4300_v11  ;;  %v353_v38 = vrot.slane %v337_v31, %v4295_v8  ;;  %v409_v39 = vrot.slane %v387_v32, %v4295_v8 }
  0x28   : > { %v417_v40 = vcombine.high %v395_v33, %v395_v33  ;;  %v2883_v21 = vrot.slane %v2869_v35, %v4300_v11  ;;  %v2900_v41 = vrot.slane %v2886_v20, %v4300_v11  ;;  %v1892_v22 = vrot.slane %v395_v33, %v4298_v10 }
  0x29   : > { %v367_v18 = vrot.slane %v339_v36, %v4295_v8  ;;  %v369_v42 = vcombine.high %v353_v38, %v353_v38  ;;  %v1876_v43 = vrot.slane %v353_v38, %v4298_v10  ;;  %v419_v44 = vcombine.high %v409_v39, %v409_v39 }
  0x2a   : > { %v1896_v45 = vrot.slane %v409_v39, %v4298_v10  ;;  %v2884_v46 = vcombine.low %v2876_v13, %v2883_v21  ;;  %v2901_v47 = vcombine.low %v2893_v37, %v2900_v41  ;;  %v1900_v52 = vrot.slane %v417_v40, %v4298_v10 }
  0x2b   : > { %v371_v48 = vcombine.high %v367_v18, %v367_v18  ;;  %v1880_v49 = vrot.slane %v367_v18, %v4298_v10  ;;  %v1884_v51 = vrot.slane %v369_v42, %v4298_v10  ;;  %v1904_v53 = vrot.slane %v419_v44, %v4298_v10 }
  0x2c   : > { %v2919_v54 = vcombine.low %v1892_v22, %v1896_v45  ;;  %3973 = vst.msk [vmem:[%s4354_s17 + $0x18] sm:$0xff] %vm3969_vm0, %v2884_v46  ;;  %3977 = vst.msk [vmem:[%s4354_s17 + $0x38] sm:$0xff] %vm3969_vm0, %v2884_v46  ;;  %v388_v57 = vcombine.high %v386_v34, %v386_v34  ;;  %v402_v58 = vrot.slane %v386_v34, %v4295_v8 }
  0x2d   : > { %3978 = vst.msk [vmem:[%s4354_s17 + $0x40] sm:$0xff] %vm3969_vm0, %v2901_v47  ;;  %3982 = vst.msk [vmem:[%s4354_s17 + $0x60] sm:$0xff] %vm3969_vm0, %v2901_v47  ;;  %v1888_v55 = vrot.slane %v371_v48, %v4298_v10  ;;  %v2902_v56 = vcombine.low %v1876_v43, %v1880_v49  ;;  %v2920_v59 = vcombine.low %v1900_v52, %v1904_v53 }
  0x2e   : > { %v2927_v60 = vrot.slane %v2919_v54, %v4300_v11  ;;  %v428_v61 = vrot.slane %v165_v50, %v4295_v8  ;;  %v421_v62 = vcombine.high %v165_v50, %v165_v50  ;;  %v416_v1 = vrot.slane %v388_v57, %v4295_v8 }
  0x2f   : > { %v2903_v63 = vcombine.low %v1884_v51, %v1888_v55  ;;  %v2910_v0 = vrot.slane %v2902_v56, %v4300_v11  ;;  %v418_v2 = vcombine.high %v402_v58, %v402_v58  ;;  %v2934_v3 = vrot.slane %v2920_v59, %v4300_v11  ;;  %v167_v51 = vld [vmem:[%s4293_s13 + $0x30] sm:$0xff] }
  0x30   : > { %v1908_v4 = vrot.slane %v402_v58, %v4298_v10  ;;  %v436_v5 = vcombine.high %v428_v61, %v428_v61  ;;  %v444_v6 = vrot.slane %v428_v61, %v4295_v8  ;;  %v420_v9 = vcombine.high %v416_v1, %v416_v1 }
  0x31   : > { %v2917_v7 = vrot.slane %v2903_v63, %v4300_v11  ;;  %v1912_v12 = vrot.slane %v416_v1, %v4298_v10  ;;  %v1916_v14 = vrot.slane %v418_v2, %v4298_v10  ;;  %v2935_v15 = vcombine.low %v2927_v60, %v2934_v3 }
  0x32   : > { %v458_v16 = vrot.slane %v436_v5, %v4295_v8  ;;  %v466_v17 = vcombine.high %v444_v6, %v444_v6  ;;  %v1924_v19 = vrot.slane %v444_v6, %v4298_v10  ;;  %v1920_v24 = vrot.slane %v420_v9, %v4298_v10 }
  0x33   : > { %v2918_v23 = vcombine.low %v2910_v0, %v2917_v7  ;;  %v2936_v25 = vcombine.low %v1908_v4, %v1912_v12  ;;  %v435_v26 = vrot.slane %v421_v62, %v4295_v8  ;;  %3980 = vst.msk [vmem:[%s4354_s17 + $0x50] sm:$0xff] %vm3969_vm0, %v2935_v15  ;;  %3984 = vst.msk [vmem:[%s4354_s17 + $0x70] sm:$0xff] %vm3969_vm0, %v2935_v15 }
  0x34   : > { %v468_v28 = vcombine.high %v458_v16, %v458_v16  ;;  %v1928_v29 = vrot.slane %v458_v16, %v4298_v10  ;;  %v1932_v31 = vrot.slane %v466_v17, %v4298_v10  ;;  %v477_v30 = vrot.slane %v166_v27, %v4295_v8 }
  0x35   : > { %3979 = vst.msk [vmem:[%s4354_s17 + $0x48] sm:$0xff] %vm3969_vm0, %v2918_v23  ;;  %3983 = vst.msk [vmem:[%s4354_s17 + $0x68] sm:$0xff] %vm3969_vm0, %v2918_v23  ;;  %v2937_v32 = vcombine.low %v1916_v14, %v1920_v24  ;;  %v2944_v33 = vrot.slane %v2936_v25, %v4300_v11  ;;  %v437_v34 = vcombine.high %v435_v26, %v435_v26 }
  0x36   : > { %v451_v35 = vrot.slane %v435_v26, %v4295_v8  ;;  %v1936_v13 = vrot.slane %v468_v28, %v4298_v10  ;;  %v2953_v20 = vcombine.low %v1924_v19, %v1928_v29  ;;  %v485_v36 = vcombine.high %v477_v30, %v477_v30  ;;  %v168_v28 = vld [vmem:[%s4293_s13 + $0x38] sm:$0xff] }
  0x37   : > { %v493_v37 = vrot.slane %v477_v30, %v4295_v8  ;;  %v2951_v38 = vrot.slane %v2937_v32, %v4300_v11  ;;  %v465_v39 = vrot.slane %v437_v34, %v4295_v8  ;;  %v470_v55 = vcombine.high %v166_v27, %v166_v27 }
  0x38   : > { %v467_v40 = vcombine.high %v451_v35, %v451_v35  ;;  %v1940_v21 = vrot.slane %v451_v35, %v4298_v10  ;;  %v2954_v41 = vcombine.low %v1932_v31, %v1936_v13  ;;  %v2961_v18 = vrot.slane %v2953_v20, %v4300_v11 }
  0x39   : > { %v507_v22 = vrot.slane %v485_v36, %v4295_v8  ;;  %v515_v42 = vcombine.high %v493_v37, %v493_v37  ;;  %v2952_v43 = vcombine.low %v2944_v33, %v2951_v38  ;;  %v469_v44 = vcombine.high %v465_v39, %v465_v39 }
  0x3a   : > { %v1944_v45 = vrot.slane %v465_v39, %v4298_v10  ;;  %v1948_v46 = vrot.slane %v467_v40, %v4298_v10  ;;  %v2968_v47 = vrot.slane %v2954_v41, %v4300_v11  ;;  %v1956_v49 = vrot.slane %v493_v37, %v4298_v10 }
  0x3b   : > { %v517_v48 = vcombine.high %v507_v22, %v507_v22  ;;  %v1960_v50 = vrot.slane %v507_v22, %v4298_v10  ;;  %3981 = vst.msk [vmem:[%s4354_s17 + $0x58] sm:$0xff] %vm3969_vm0, %v2952_v43  ;;  %3985 = vst.msk [vmem:[%s4354_s17 + $0x78] sm:$0xff] %vm3969_vm0, %v2952_v43  ;;  %v1952_v52 = vrot.slane %v469_v44, %v4298_v10 }
  0x3c   : > { %v2970_v53 = vcombine.low %v1940_v21, %v1944_v45  ;;  %v1964_v54 = vrot.slane %v515_v42, %v4298_v10  ;;  %v2969_v56 = vcombine.low %v2961_v18, %v2968_v47  ;;  %v526_v59 = vrot.slane %v167_v51, %v4295_v8 }
  0x3d   : > { %v1968_v57 = vrot.slane %v517_v48, %v4298_v10  ;;  %v2987_v58 = vcombine.low %v1956_v49, %v1960_v50  ;;  %v2971_v60 = vcombine.low %v1948_v46, %v1952_v52  ;;  %v484_v62 = vrot.slane %v470_v55, %v4295_v8 }
  0x3e   : > { %v2978_v61 = vrot.slane %v2970_v53, %v4300_v11  ;;  %v519_v63 = vcombine.high %v167_v51, %v167_v51  ;;  %3986 = vst.msk [vmem:[%s4354_s17 + $0x80] sm:$0xff] %vm3969_vm0, %v2969_v56  ;;  %3990 = vst.msk [vmem:[%s4354_s17 + $0xa0] sm:$0xff] %vm3969_vm0, %v2969_v56  ;;  %v534_v2 = vcombine.high %v526_v59, %v526_v59  ;;  %v169_v56 = vld [vmem:[%s4293_s13 + $0x40] sm:$0xff] }
  0x3f   : > { %v2988_v0 = vcombine.low %v1964_v54, %v1968_v57  ;;  %v2995_v1 = vrot.slane %v2987_v58, %v4300_v11  ;;  %v542_v3 = vrot.slane %v526_v59, %v4295_v8  ;;  %v2985_v4 = vrot.slane %v2971_v60, %v4300_v11 }
  0x40   : > { %v486_v5 = vcombine.high %v484_v62, %v484_v62  ;;  %v500_v6 = vrot.slane %v484_v62, %v4295_v8  ;;  %v533_v7 = vrot.slane %v519_v63, %v4295_v8  ;;  %v556_v12 = vrot.slane %v534_v2, %v4295_v8 }
  0x41   : > { %v3002_v9 = vrot.slane %v2988_v0, %v4300_v11  ;;  %v564_v14 = vcombine.high %v542_v3, %v542_v3  ;;  %v1988_v15 = vrot.slane %v542_v3, %v4298_v10  ;;  %v2986_v16 = vcombine.low %v2978_v61, %v2985_v4 }
  0x42   : > { %v514_v17 = vrot.slane %v486_v5, %v4295_v8  ;;  %v516_v19 = vcombine.high %v500_v6, %v500_v6  ;;  %v1972_v23 = vrot.slane %v500_v6, %v4298_v10  ;;  %v566_v25 = vcombine.high %v556_v12, %v556_v12 }
  0x43   : > { %v3003_v24 = vcombine.low %v2995_v1, %v3002_v9  ;;  %v1992_v26 = vrot.slane %v556_v12, %v4298_v10  ;;  %v1996_v27 = vrot.slane %v564_v14, %v4298_v10  ;;  %3987 = vst.msk [vmem:[%s4354_s17 + $0x88] sm:$0xff] %vm3969_vm0, %v2986_v16  ;;  %3991 = vst.msk [vmem:[%s4354_s17 + $0xa8] sm:$0xff] %vm3969_vm0, %v2986_v16 }
  0x44   : > { %v518_v29 = vcombine.high %v514_v17, %v514_v17  ;;  %v1976_v31 = vrot.slane %v514_v17, %v4298_v10  ;;  %v1980_v30 = vrot.slane %v516_v19, %v4298_v10  ;;  %v535_v32 = vcombine.high %v533_v7, %v533_v7 }
  0x45   : > { %3988 = vst.msk [vmem:[%s4354_s17 + $0x90] sm:$0xff] %vm3969_vm0, %v3003_v24  ;;  %3992 = vst.msk [vmem:[%s4354_s17 + $0xb0] sm:$0xff] %vm3969_vm0, %v3003_v24  ;;  %v2000_v33 = vrot.slane %v566_v25, %v4298_v10  ;;  %v3021_v34 = vcombine.low %v1988_v15, %v1992_v26  ;;  %v549_v35 = vrot.slane %v533_v7, %v4295_v8 }
  0x46   : > { %v575_v13 = vrot.slane %v168_v28, %v4295_v8  ;;  %v1984_v20 = vrot.slane %v518_v29, %v4298_v10  ;;  %v3004_v36 = vcombine.low %v1972_v23, %v1976_v31  ;;  %v563_v37 = vrot.slane %v535_v32, %v4295_v8  ;;  %v170_v29 = vld [vmem:[%s4293_s13 + $0x48] sm:$0xff] }
  0x47   : > { %v568_v38 = vcombine.high %v168_v28, %v168_v28  ;;  %v3022_v39 = vcombine.low %v1996_v27, %v2000_v33  ;;  %v3029_v40 = vrot.slane %v3021_v34, %v4300_v11  ;;  %v565_v21 = vcombine.high %v549_v35, %v549_v35 }
  0x48   : > { %v2004_v41 = vrot.slane %v549_v35, %v4298_v10  ;;  %v3005_v18 = vcombine.low %v1980_v30, %v1984_v20  ;;  %v3012_v22 = vrot.slane %v3004_v36, %v4300_v11  ;;  %v567_v42 = vcombine.high %v563_v37, %v563_v37 }
  0x49   : > { %v2008_v43 = vrot.slane %v563_v37, %v4298_v10  ;;  %v3036_v44 = vrot.slane %v3022_v39, %v4300_v11  ;;  %v2012_v45 = vrot.slane %v565_v21, %v4298_v10  ;;  %v583_v46 = vcombine.high %v575_v13, %v575_v13 }
  0x4a   : > { %v591_v47 = vrot.slane %v575_v13, %v4295_v8  ;;  %v3019_v48 = vrot.slane %v3005_v18, %v4300_v11  ;;  %v2016_v49 = vrot.slane %v567_v42, %v4298_v10  ;;  %v582_v51 = vrot.slane %v568_v38, %v4295_v8 }
  0x4b   : > { %v3038_v50 = vcombine.low %v2004_v41, %v2008_v43  ;;  %v3037_v52 = vcombine.low %v3029_v40, %v3036_v44  ;;  %v605_v53 = vrot.slane %v583_v46, %v4295_v8  ;;  %v624_v3 = vrot.slane %v169_v56, %v4295_v8 }
  0x4c   : > { %v613_v54 = vcombine.high %v591_v47, %v591_v47  ;;  %v2020_v55 = vrot.slane %v591_v47, %v4298_v10  ;;  %v3020_v57 = vcombine.low %v3012_v22, %v3019_v48  ;;  %v3039_v58 = vcombine.low %v2012_v45, %v2016_v49 }
  0x4d   : > { %v3046_v59 = vrot.slane %v3038_v50, %v4300_v11  ;;  %v584_v60 = vcombine.high %v582_v51, %v582_v51  ;;  %3994 = vst.msk [vmem:[%s4354_s17 + $0xc0] sm:$0xff] %vm3969_vm0, %v3037_v52  ;;  %3998 = vst.msk [vmem:[%s4354_s17 + $0xe0] sm:$0xff] %vm3969_vm0, %v3037_v52  ;;  %v615_v61 = vcombine.high %v605_v53, %v605_v53 }
  0x4e   : > { %v2024_v62 = vrot.slane %v605_v53, %v4298_v10  ;;  %v2028_v63 = vrot.slane %v613_v54, %v4298_v10  ;;  %v598_v0 = vrot.slane %v582_v51, %v4295_v8  ;;  %3989 = vst.msk [vmem:[%s4354_s17 + $0x98] sm:$0xff] %vm3969_vm0, %v3020_v57  ;;  %3993 = vst.msk [vmem:[%s4354_s17 + $0xb8] sm:$0xff] %vm3969_vm0, %v3020_v57  ;;  %v171_v57 = vld [vmem:[%s4293_s13 + $0x50] sm:$0xff] }
  0x4f   : > { %v3053_v1 = vrot.slane %v3039_v58, %v4300_v11  ;;  %v612_v2 = vrot.slane %v584_v60, %v4295_v8  ;;  %v617_v4 = vcombine.high %v169_v56, %v169_v56  ;;  %v2032_v5 = vrot.slane %v615_v61, %v4298_v10 }
  0x50   : > { %v3055_v6 = vcombine.low %v2020_v55, %v2024_v62  ;;  %v614_v7 = vcombine.high %v598_v0, %v598_v0  ;;  %v2036_v9 = vrot.slane %v598_v0, %v4298_v10  ;;  %v632_v16 = vcombine.high %v624_v3, %v624_v3 }
  0x51   : > { %v3054_v12 = vcombine.low %v3046_v59, %v3053_v1  ;;  %v616_v14 = vcombine.high %v612_v2, %v612_v2  ;;  %v2040_v15 = vrot.slane %v612_v2, %v4298_v10  ;;  %v3056_v17 = vcombine.low %v2028_v63, %v2032_v5 }
  0x52   : > { %v3063_v19 = vrot.slane %v3055_v6, %v4300_v11  ;;  %v2044_v23 = vrot.slane %v614_v7, %v4298_v10  ;;  %v640_v24 = vrot.slane %v624_v3, %v4295_v8  ;;  %v654_v27 = vrot.slane %v632_v16, %v4295_v8 }
  0x53   : > { %3995 = vst.msk [vmem:[%s4354_s17 + $0xc8] sm:$0xff] %vm3969_vm0, %v3054_v12  ;;  %3999 = vst.msk [vmem:[%s4354_s17 + $0xe8] sm:$0xff] %vm3969_vm0, %v3054_v12  ;;  %v2048_v25 = vrot.slane %v616_v14, %v4298_v10  ;;  %v3072_v26 = vcombine.low %v2036_v9, %v2040_v15  ;;  %v631_v28 = vrot.slane %v617_v4, %v4295_v8 }
  0x54   : > { %v3070_v31 = vrot.slane %v3056_v17, %v4300_v11  ;;  %v662_v30 = vcombine.high %v640_v24, %v640_v24  ;;  %v2052_v32 = vrot.slane %v640_v24, %v4298_v10  ;;  %v673_v33 = vrot.slane %v170_v29, %v4295_v8 }
  0x55   : > { %v3073_v34 = vcombine.low %v2044_v23, %v2048_v25  ;;  %v3080_v35 = vrot.slane %v3072_v26, %v4300_v11  ;;  %v664_v13 = vcombine.high %v654_v27, %v654_v27  ;;  %v2056_v20 = vrot.slane %v654_v27, %v4298_v10 }
  0x56   : > { %v3071_v36 = vcombine.low %v3063_v19, %v3070_v31  ;;  %v2060_v37 = vrot.slane %v662_v30, %v4298_v10  ;;  %v633_v38 = vcombine.high %v631_v28, %v631_v28  ;;  %v647_v39 = vrot.slane %v631_v28, %v4295_v8 }
  0x57   : > { %v3087_v40 = vrot.slane %v3073_v34, %v4300_v11  ;;  %v2064_v21 = vrot.slane %v664_v13, %v4298_v10  ;;  %v3089_v41 = vcombine.low %v2052_v32, %v2056_v20  ;;  %v681_v18 = vcombine.high %v673_v33, %v673_v33  ;;  %v172_v34 = vld [vmem:[%s4293_s13 + $0x58] sm:$0xff] }
  0x58   : > { %3996 = vst.msk [vmem:[%s4354_s17 + $0xd0] sm:$0xff] %vm3969_vm0, %v3071_v36  ;;  %4000 = vst.msk [vmem:[%s4354_s17 + $0xf0] sm:$0xff] %vm3969_vm0, %v3071_v36  ;;  %v661_v22 = vrot.slane %v633_v38, %v4295_v8  ;;  %v663_v42 = vcombine.high %v647_v39, %v647_v39  ;;  %v2068_v43 = vrot.slane %v647_v39, %v4298_v10 }
  0x59   : > { %v689_v44 = vrot.slane %v673_v33, %v4295_v8  ;;  %v3088_v45 = vcombine.low %v3080_v35, %v3087_v40  ;;  %v3090_v46 = vcombine.low %v2060_v37, %v2064_v21  ;;  %v3097_v47 = vrot.slane %v3089_v41, %v4300_v11 }
  0x5a   : > { %v703_v48 = vrot.slane %v681_v18, %v4295_v8  ;;  %v665_v49 = vcombine.high %v661_v22, %v661_v22  ;;  %v2072_v50 = vrot.slane %v661_v22, %v4298_v10  ;;  %v2076_v51 = vrot.slane %v663_v42, %v4298_v10 }
  0x5b   : > { %v711_v52 = vcombine.high %v689_v44, %v689_v44  ;;  %3997 = vst.msk [vmem:[%s4354_s17 + $0xd8] sm:$0xff] %vm3969_vm0, %v3088_v45  ;;  %4001 = vst.msk [vmem:[%s4354_s17 + $0xf8] sm:$0xff] %vm3969_vm0, %v3088_v45  ;;  %v3104_v53 = vrot.slane %v3090_v46, %v4300_v11  ;;  %v2084_v55 = vrot.slane %v689_v44, %v4298_v10 }
  0x5c   : > { %v713_v54 = vcombine.high %v703_v48, %v703_v48  ;;  %v2088_v56 = vrot.slane %v703_v48, %v4298_v10  ;;  %v2080_v58 = vrot.slane %v665_v49, %v4298_v10  ;;  %v3106_v59 = vcombine.low %v2068_v43, %v2072_v50 }
  0x5d   : > { %v2092_v60 = vrot.slane %v711_v52, %v4298_v10  ;;  %v666_v61 = vcombine.high %v170_v29, %v170_v29  ;;  %v3105_v62 = vcombine.low %v3097_v47, %v3104_v53  ;;  %v722_v1 = vrot.slane %v171_v57, %v4295_v8 }
  0x5e   : > { %v2096_v63 = vrot.slane %v713_v54, %v4298_v10  ;;  %v3123_v0 = vcombine.low %v2084_v55, %v2088_v56  ;;  %v3107_v2 = vcombine.low %v2076_v51, %v2080_v58  ;;  %v3114_v3 = vrot.slane %v3106_v59, %v4300_v11 }
  0x5f   : > { %v680_v4 = vrot.slane %v666_v61, %v4295_v8  ;;  %v715_v5 = vcombine.high %v171_v57, %v171_v57  ;;  %4002 = vst.msk [vmem:[%s4354_s17 + $0x100] sm:$0xff] %vm3969_vm0, %v3105_v62  ;;  %4006 = vst.msk [vmem:[%s4354_s17 + $0x120] sm:$0xff] %vm3969_vm0, %v3105_v62  ;;  %v730_v9 = vcombine.high %v722_v1, %v722_v1  ;;  %v173_v62 = vld [vmem:[%s4293_s13 + $0x60] sm:$0xff] }
  0x60   : > { %v3124_v6 = vcombine.low %v2092_v60, %v2096_v63  ;;  %v3131_v7 = vrot.slane %v3123_v0, %v4300_v11  ;;  %v738_v12 = vrot.slane %v722_v1, %v4295_v8  ;;  %v3121_v14 = vrot.slane %v3107_v2, %v4300_v11 }
  0x61   : > { %v682_v15 = vcombine.high %v680_v4, %v680_v4  ;;  %v696_v16 = vrot.slane %v680_v4, %v4295_v8  ;;  %v729_v17 = vrot.slane %v715_v5, %v4295_v8  ;;  %v752_v23 = vrot.slane %v730_v9, %v4295_v8 }
  0x62   : > { %v3138_v19 = vrot.slane %v3124_v6, %v4300_v11  ;;  %v760_v24 = vcombine.high %v738_v12, %v738_v12  ;;  %v2116_v25 = vrot.slane %v738_v12, %v4298_v10  ;;  %v3122_v26 = vcombine.low %v3114_v3, %v3121_v14 }
  0x63   : > { %v710_v27 = vrot.slane %v682_v15, %v4295_v8  ;;  %v712_v28 = vcombine.high %v696_v16, %v696_v16  ;;  %v2100_v29 = vrot.slane %v696_v16, %v4298_v10  ;;  %v762_v30 = vcombine.high %v752_v23, %v752_v23 }
  0x64   : > { %v3139_v31 = vcombine.low %v3131_v7, %v3138_v19  ;;  %v2120_v32 = vrot.slane %v752_v23, %v4298_v10  ;;  %v2124_v33 = vrot.slane %v760_v24, %v4298_v10  ;;  %4003 = vst.msk [vmem:[%s4354_s17 + $0x108] sm:$0xff] %vm3969_vm0, %v3122_v26  ;;  %4007 = vst.msk [vmem:[%s4354_s17 + $0x128] sm:$0xff] %vm3969_vm0, %v3122_v26 }
  0x65   : > { %v714_v35 = vcombine.high %v710_v27, %v710_v27  ;;  %v2104_v13 = vrot.slane %v710_v27, %v4298_v10  ;;  %v2108_v20 = vrot.slane %v712_v28, %v4298_v10  ;;  %v731_v36 = vcombine.high %v729_v17, %v729_v17 }
  0x66   : > { %4004 = vst.msk [vmem:[%s4354_s17 + $0x110] sm:$0xff] %vm3969_vm0, %v3139_v31  ;;  %4008 = vst.msk [vmem:[%s4354_s17 + $0x130] sm:$0xff] %vm3969_vm0, %v3139_v31  ;;  %v2128_v37 = vrot.slane %v762_v30, %v4298_v10  ;;  %v3157_v38 = vcombine.low %v2116_v25, %v2120_v32  ;;  %v745_v39 = vrot.slane %v729_v17, %v4295_v8 }
  0x67   : > { %v771_v40 = vrot.slane %v172_v34, %v4295_v8  ;;  %v2112_v21 = vrot.slane %v714_v35, %v4298_v10  ;;  %v3140_v41 = vcombine.low %v2100_v29, %v2104_v13  ;;  %v759_v18 = vrot.slane %v731_v36, %v4295_v8  ;;  %v174_v35 = vld [vmem:[%s4293_s13 + $0x68] sm:$0xff] }
  0x68   : > { %v764_v22 = vcombine.high %v172_v34, %v172_v34  ;;  %v3158_v42 = vcombine.low %v2124_v33, %v2128_v37  ;;  %v3165_v43 = vrot.slane %v3157_v38, %v4300_v11  ;;  %v761_v44 = vcombine.high %v745_v39, %v745_v39 }
  0x69   : > { %v2132_v45 = vrot.slane %v745_v39, %v4298_v10  ;;  %v3141_v46 = vcombine.low %v2108_v20, %v2112_v21  ;;  %v3148_v47 = vrot.slane %v3140_v41, %v4300_v11  ;;  %v763_v48 = vcombine.high %v759_v18, %v759_v18 }
  0x6a   : > { %v2136_v49 = vrot.slane %v759_v18, %v4298_v10  ;;  %v3172_v50 = vrot.slane %v3158_v42, %v4300_v11  ;;  %v2140_v51 = vrot.slane %v761_v44, %v4298_v10  ;;  %v779_v52 = vcombine.high %v771_v40, %v771_v40 }
  0x6b   : > { %v787_v53 = vrot.slane %v771_v40, %v4295_v8  ;;  %v3155_v54 = vrot.slane %v3141_v46, %v4300_v11  ;;  %v2144_v55 = vrot.slane %v763_v48, %v4298_v10  ;;  %v778_v57 = vrot.slane %v764_v22, %v4295_v8 }
  0x6c   : > { %v3174_v56 = vcombine.low %v2132_v45, %v2136_v49  ;;  %v3173_v58 = vcombine.low %v3165_v43, %v3172_v50  ;;  %v801_v59 = vrot.slane %v779_v52, %v4295_v8  ;;  %v820_v12 = vrot.slane %v173_v62, %v4295_v8 }
  0x6d   : > { %v809_v60 = vcombine.high %v787_v53, %v787_v53  ;;  %v2148_v61 = vrot.slane %v787_v53, %v4298_v10  ;;  %v3156_v63 = vcombine.low %v3148_v47, %v3155_v54  ;;  %v3175_v0 = vcombine.low %v2140_v51, %v2144_v55 }
  0x6e   : > { %v3182_v1 = vrot.slane %v3174_v56, %v4300_v11  ;;  %v780_v2 = vcombine.high %v778_v57, %v778_v57  ;;  %4010 = vst.msk [vmem:[%s4354_s17 + $0x140] sm:$0xff] %vm3969_vm0, %v3173_v58  ;;  %4014 = vst.msk [vmem:[%s4354_s17 + $0x160] sm:$0xff] %vm3969_vm0, %v3173_v58  ;;  %v811_v3 = vcombine.high %v801_v59, %v801_v59 }
  0x6f   : > { %v2152_v4 = vrot.slane %v801_v59, %v4298_v10  ;;  %v2156_v5 = vrot.slane %v809_v60, %v4298_v10  ;;  %v794_v6 = vrot.slane %v778_v57, %v4295_v8  ;;  %4005 = vst.msk [vmem:[%s4354_s17 + $0x118] sm:$0xff] %vm3969_vm0, %v3156_v63  ;;  %4009 = vst.msk [vmem:[%s4354_s17 + $0x138] sm:$0xff] %vm3969_vm0, %v3156_v63  ;;  %v175_v63 = vld [vmem:[%s4293_s13 + $0x70] sm:$0xff] }
  0x70   : > { %v3189_v7 = vrot.slane %v3175_v0, %v4300_v11  ;;  %v808_v9 = vrot.slane %v780_v2, %v4295_v8  ;;  %v813_v14 = vcombine.high %v173_v62, %v173_v62  ;;  %v2160_v15 = vrot.slane %v811_v3, %v4298_v10 }
  0x71   : > { %v3191_v16 = vcombine.low %v2148_v61, %v2152_v4  ;;  %v810_v17 = vcombine.high %v794_v6, %v794_v6  ;;  %v2164_v19 = vrot.slane %v794_v6, %v4298_v10  ;;  %v828_v26 = vcombine.high %v820_v12, %v820_v12 }
  0x72   : > { %v3190_v23 = vcombine.low %v3182_v1, %v3189_v7  ;;  %v812_v24 = vcombine.high %v808_v9, %v808_v9  ;;  %v2168_v25 = vrot.slane %v808_v9, %v4298_v10  ;;  %v3192_v27 = vcombine.low %v2156_v5, %v2160_v15 }
  0x73   : > { %v3199_v28 = vrot.slane %v3191_v16, %v4300_v11  ;;  %v2172_v29 = vrot.slane %v810_v17, %v4298_v10  ;;  %v836_v31 = vrot.slane %v820_v12, %v4295_v8  ;;  %v850_v33 = vrot.slane %v828_v26, %v4295_v8 }
  0x74   : > { %4011 = vst.msk [vmem:[%s4354_s17 + $0x148] sm:$0xff] %vm3969_vm0, %v3190_v23  ;;  %4015 = vst.msk [vmem:[%s4354_s17 + $0x168] sm:$0xff] %vm3969_vm0, %v3190_v23  ;;  %v2176_v30 = vrot.slane %v812_v24, %v4298_v10  ;;  %v3208_v32 = vcombine.low %v2164_v19, %v2168_v25  ;;  %v827_v34 = vrot.slane %v813_v14, %v4295_v8 }
  0x75   : > { %v3206_v13 = vrot.slane %v3192_v27, %v4300_v11  ;;  %v858_v20 = vcombine.high %v836_v31, %v836_v31  ;;  %v2180_v36 = vrot.slane %v836_v31, %v4298_v10  ;;  %v869_v37 = vrot.slane %v174_v35, %v4295_v8 }
  0x76   : > { %v3209_v38 = vcombine.low %v2172_v29, %v2176_v30  ;;  %v3216_v39 = vrot.slane %v3208_v32, %v4300_v11  ;;  %v860_v40 = vcombine.high %v850_v33, %v850_v33  ;;  %v2184_v21 = vrot.slane %v850_v33, %v4298_v10 }
  0x77   : > { %v3207_v41 = vcombine.low %v3199_v28, %v3206_v13  ;;  %v2188_v18 = vrot.slane %v858_v20, %v4298_v10  ;;  %v829_v22 = vcombine.high %v827_v34, %v827_v34  ;;  %v843_v42 = vrot.slane %v827_v34, %v4295_v8 }
  0x78   : > { %v3223_v43 = vrot.slane %v3209_v38, %v4300_v11  ;;  %v2192_v44 = vrot.slane %v860_v40, %v4298_v10  ;;  %v3225_v45 = vcombine.low %v2180_v36, %v2184_v21  ;;  %v877_v46 = vcombine.high %v869_v37, %v869_v37  ;;  %v176_v38 = vld [vmem:[%s4293_s13 + $0x78] sm:$0xff] }
  0x79   : > { %4012 = vst.msk [vmem:[%s4354_s17 + $0x150] sm:$0xff] %vm3969_vm0, %v3207_v41  ;;  %4016 = vst.msk [vmem:[%s4354_s17 + $0x170] sm:$0xff] %vm3969_vm0, %v3207_v41  ;;  %v857_v47 = vrot.slane %v829_v22, %v4295_v8  ;;  %v859_v48 = vcombine.high %v843_v42, %v843_v42  ;;  %v2196_v49 = vrot.slane %v843_v42, %v4298_v10 }
  0x7a   : > { %v885_v50 = vrot.slane %v869_v37, %v4295_v8  ;;  %v3224_v51 = vcombine.low %v3216_v39, %v3223_v43  ;;  %v3226_v52 = vcombine.low %v2188_v18, %v2192_v44  ;;  %v3233_v53 = vrot.slane %v3225_v45, %v4300_v11 }
  0x7b   : > { %v899_v54 = vrot.slane %v877_v46, %v4295_v8  ;;  %v861_v55 = vcombine.high %v857_v47, %v857_v47  ;;  %v2200_v56 = vrot.slane %v857_v47, %v4298_v10  ;;  %v2204_v57 = vrot.slane %v859_v48, %v4298_v10 }
  0x7c   : > { %v907_v58 = vcombine.high %v885_v50, %v885_v50  ;;  %4013 = vst.msk [vmem:[%s4354_s17 + $0x158] sm:$0xff] %vm3969_vm0, %v3224_v51  ;;  %4017 = vst.msk [vmem:[%s4354_s17 + $0x178] sm:$0xff] %vm3969_vm0, %v3224_v51  ;;  %v3240_v59 = vrot.slane %v3226_v52, %v4300_v11  ;;  %v2212_v61 = vrot.slane %v885_v50, %v4298_v10 }
  0x7d   : > { %v909_v60 = vcombine.high %v899_v54, %v899_v54  ;;  %v2216_v62 = vrot.slane %v899_v54, %v4298_v10  ;;  %v2208_v0 = vrot.slane %v861_v55, %v4298_v10  ;;  %v3242_v1 = vcombine.low %v2196_v49, %v2200_v56 }
  0x7e   : > { %v2220_v2 = vrot.slane %v907_v58, %v4298_v10  ;;  %v862_v3 = vcombine.high %v174_v35, %v174_v35  ;;  %v3241_v4 = vcombine.low %v3233_v53, %v3240_v59  ;;  %v918_v7 = vrot.slane %v175_v63, %v4295_v8 }
  0x7f   : > { %v2224_v5 = vrot.slane %v909_v60, %v4298_v10  ;;  %v3259_v6 = vcombine.low %v2212_v61, %v2216_v62  ;;  %v3243_v9 = vcombine.low %v2204_v57, %v2208_v0  ;;  %v3250_v12 = vrot.slane %v3242_v1, %v4300_v11 }
  0x80   : > { %v876_v14 = vrot.slane %v862_v3, %v4295_v8  ;;  %v911_v15 = vcombine.high %v175_v63, %v175_v63  ;;  %4018 = vst.msk [vmem:[%s4354_s17 + $0x180] sm:$0xff] %vm3969_vm0, %v3241_v4  ;;  %4022 = vst.msk [vmem:[%s4354_s17 + $0x1a0] sm:$0xff] %vm3969_vm0, %v3241_v4  ;;  %v926_v19 = vcombine.high %v918_v7, %v918_v7  ;;  %v177_v4 = vld [vmem:[%s4293_s13 + $0x80] sm:$0xff] }
  0x81   : > { %v3260_v16 = vcombine.low %v2220_v2, %v2224_v5  ;;  %v3267_v17 = vrot.slane %v3259_v6, %v4300_v11  ;;  %v934_v23 = vrot.slane %v918_v7, %v4295_v8  ;;  %v3257_v24 = vrot.slane %v3243_v9, %v4300_v11 }
  0x82   : > { %v878_v25 = vcombine.high %v876_v14, %v876_v14  ;;  %v892_v26 = vrot.slane %v876_v14, %v4295_v8  ;;  %v925_v27 = vrot.slane %v911_v15, %v4295_v8  ;;  %v948_v29 = vrot.slane %v926_v19, %v4295_v8 }
  0x83   : > { %v3274_v28 = vrot.slane %v3260_v16, %v4300_v11  ;;  %v956_v31 = vcombine.high %v934_v23, %v934_v23  ;;  %v2244_v30 = vrot.slane %v934_v23, %v4298_v10  ;;  %v3258_v32 = vcombine.low %v3250_v12, %v3257_v24 }
  0x84   : > { %v906_v33 = vrot.slane %v878_v25, %v4295_v8  ;;  %v908_v34 = vcombine.high %v892_v26, %v892_v26  ;;  %v2228_v35 = vrot.slane %v892_v26, %v4298_v10  ;;  %v958_v20 = vcombine.high %v948_v29, %v948_v29 }
  0x85   : > { %v3275_v13 = vcombine.low %v3267_v17, %v3274_v28  ;;  %v2248_v36 = vrot.slane %v948_v29, %v4298_v10  ;;  %v2252_v37 = vrot.slane %v956_v31, %v4298_v10  ;;  %4019 = vst.msk [vmem:[%s4354_s17 + $0x188] sm:$0xff] %vm3969_vm0, %v3258_v32  ;;  %4023 = vst.msk [vmem:[%s4354_s17 + $0x1a8] sm:$0xff] %vm3969_vm0, %v3258_v32 }
  0x86   : > { %v910_v39 = vcombine.high %v906_v33, %v906_v33  ;;  %v2232_v40 = vrot.slane %v906_v33, %v4298_v10  ;;  %v2236_v21 = vrot.slane %v908_v34, %v4298_v10  ;;  %v927_v41 = vcombine.high %v925_v27, %v925_v27 }
  0x87   : > { %4020 = vst.msk [vmem:[%s4354_s17 + $0x190] sm:$0xff] %vm3969_vm0, %v3275_v13  ;;  %4024 = vst.msk [vmem:[%s4354_s17 + $0x1b0] sm:$0xff] %vm3969_vm0, %v3275_v13  ;;  %v2256_v18 = vrot.slane %v958_v20, %v4298_v10  ;;  %v3293_v22 = vcombine.low %v2244_v30, %v2248_v36  ;;  %v941_v42 = vrot.slane %v925_v27, %v4295_v8 }
  0x88   : > { %v967_v43 = vrot.slane %v176_v38, %v4295_v8  ;;  %v2240_v44 = vrot.slane %v910_v39, %v4298_v10  ;;  %v3276_v45 = vcombine.low %v2228_v35, %v2232_v40  ;;  %v955_v46 = vrot.slane %v927_v41, %v4295_v8  ;;  %v178_v39 = vld [vmem:[%s4293_s13 + $0x88] sm:$0xff] }
  0x89   : > { %v960_v47 = vcombine.high %v176_v38, %v176_v38  ;;  %v3294_v48 = vcombine.low %v2252_v37, %v2256_v18  ;;  %v3301_v49 = vrot.slane %v3293_v22, %v4300_v11  ;;  %v957_v50 = vcombine.high %v941_v42, %v941_v42 }
  0x8a   : > { %v2260_v51 = vrot.slane %v941_v42, %v4298_v10  ;;  %v3277_v52 = vcombine.low %v2236_v21, %v2240_v44  ;;  %v3284_v53 = vrot.slane %v3276_v45, %v4300_v11  ;;  %v959_v54 = vcombine.high %v955_v46, %v955_v46 }
  0x8b   : > { %v2264_v55 = vrot.slane %v955_v46, %v4298_v10  ;;  %v3308_v56 = vrot.slane %v3294_v48, %v4300_v11  ;;  %v2268_v57 = vrot.slane %v957_v50, %v4298_v10  ;;  %v975_v58 = vcombine.high %v967_v43, %v967_v43 }
  0x8c   : > { %v983_v59 = vrot.slane %v967_v43, %v4295_v8  ;;  %v3291_v60 = vrot.slane %v3277_v52, %v4300_v11  ;;  %v2272_v61 = vrot.slane %v959_v54, %v4298_v10  ;;  %v974_v63 = vrot.slane %v960_v47, %v4295_v8 }
  0x8d   : > { %v3310_v62 = vcombine.low %v2260_v51, %v2264_v55  ;;  %v3309_v0 = vcombine.low %v3301_v49, %v3308_v56  ;;  %v997_v1 = vrot.slane %v975_v58, %v4295_v8  ;;  %v1016_v23 = vrot.slane %v177_v4, %v4295_v8 }
  0x8e   : > { %v1005_v2 = vcombine.high %v983_v59, %v983_v59  ;;  %v2276_v3 = vrot.slane %v983_v59, %v4298_v10  ;;  %v3292_v5 = vcombine.low %v3284_v53, %v3291_v60  ;;  %v3311_v6 = vcombine.low %v2268_v57, %v2272_v61 }
  0x8f   : > { %v3318_v7 = vrot.slane %v3310_v62, %v4300_v11  ;;  %v976_v9 = vcombine.high %v974_v63, %v974_v63  ;;  %4026 = vst.msk [vmem:[%s4354_s17 + $0x1c0] sm:$0xff] %vm3969_vm0, %v3309_v0  ;;  %4030 = vst.msk [vmem:[%s4354_s17 + $0x1e0] sm:$0xff] %vm3969_vm0, %v3309_v0  ;;  %v1007_v12 = vcombine.high %v997_v1, %v997_v1 }
  0x90   : > { %v2280_v14 = vrot.slane %v997_v1, %v4298_v10  ;;  %v2284_v15 = vrot.slane %v1005_v2, %v4298_v10  ;;  %v990_v16 = vrot.slane %v974_v63, %v4295_v8  ;;  %4021 = vst.msk [vmem:[%s4354_s17 + $0x198] sm:$0xff] %vm3969_vm0, %v3292_v5  ;;  %4025 = vst.msk [vmem:[%s4354_s17 + $0x1b8] sm:$0xff] %vm3969_vm0, %v3292_v5  ;;  %v179_v5 = vld [vmem:[%s4293_s13 + $0x90] sm:$0xff] }
  0x91   : > { %v3325_v17 = vrot.slane %v3311_v6, %v4300_v11  ;;  %v1004_v19 = vrot.slane %v976_v9, %v4295_v8  ;;  %v1009_v24 = vcombine.high %v177_v4, %v177_v4  ;;  %v2288_v25 = vrot.slane %v1007_v12, %v4298_v10 }
  0x92   : > { %v3327_v26 = vcombine.low %v2276_v3, %v2280_v14  ;;  %v1006_v27 = vcombine.high %v990_v16, %v990_v16  ;;  %v2292_v28 = vrot.slane %v990_v16, %v4298_v10  ;;  %v1024_v32 = vcombine.high %v1016_v23, %v1016_v23 }
  0x93   : > { %v3326_v29 = vcombine.low %v3318_v7, %v3325_v17  ;;  %v1008_v31 = vcombine.high %v1004_v19, %v1004_v19  ;;  %v2296_v30 = vrot.slane %v1004_v19, %v4298_v10  ;;  %v3328_v33 = vcombine.low %v2284_v15, %v2288_v25 }
  0x94   : > { %v3335_v34 = vrot.slane %v3327_v26, %v4300_v11  ;;  %v2300_v35 = vrot.slane %v1006_v27, %v4298_v10  ;;  %v1032_v13 = vrot.slane %v1016_v23, %v4295_v8  ;;  %v1046_v37 = vrot.slane %v1024_v32, %v4295_v8 }
  0x95   : > { %4027 = vst.msk [vmem:[%s4354_s17 + $0x1c8] sm:$0xff] %vm3969_vm0, %v3326_v29  ;;  %4031 = vst.msk [vmem:[%s4354_s17 + $0x1e8] sm:$0xff] %vm3969_vm0, %v3326_v29  ;;  %v2304_v20 = vrot.slane %v1008_v31, %v4298_v10  ;;  %v3344_v36 = vcombine.low %v2292_v28, %v2296_v30  ;;  %v1023_v38 = vrot.slane %v1009_v24, %v4295_v8 }
  0x96   : > { %v3342_v40 = vrot.slane %v3328_v33, %v4300_v11  ;;  %v1054_v21 = vcombine.high %v1032_v13, %v1032_v13  ;;  %v2308_v41 = vrot.slane %v1032_v13, %v4298_v10  ;;  %v1065_v18 = vrot.slane %v178_v39, %v4295_v8 }
  0x97   : > { %v3345_v22 = vcombine.low %v2300_v35, %v2304_v20  ;;  %v3352_v42 = vrot.slane %v3344_v36, %v4300_v11  ;;  %v1056_v43 = vcombine.high %v1046_v37, %v1046_v37  ;;  %v2312_v44 = vrot.slane %v1046_v37, %v4298_v10 }
  0x98   : > { %v3343_v45 = vcombine.low %v3335_v34, %v3342_v40  ;;  %v2316_v46 = vrot.slane %v1054_v21, %v4298_v10  ;;  %v1025_v47 = vcombine.high %v1023_v38, %v1023_v38  ;;  %v1039_v48 = vrot.slane %v1023_v38, %v4295_v8 }
  0x99   : > { %v3359_v49 = vrot.slane %v3345_v22, %v4300_v11  ;;  %v2320_v50 = vrot.slane %v1056_v43, %v4298_v10  ;;  %v3361_v51 = vcombine.low %v2308_v41, %v2312_v44  ;;  %v1073_v52 = vcombine.high %v1065_v18, %v1065_v18  ;;  %v180_v22 = vld [vmem:[%s4293_s13 + $0x98] sm:$0xff] }
  0x9a   : > { %4028 = vst.msk [vmem:[%s4354_s17 + $0x1d0] sm:$0xff] %vm3969_vm0, %v3343_v45  ;;  %4032 = vst.msk [vmem:[%s4354_s17 + $0x1f0] sm:$0xff] %vm3969_vm0, %v3343_v45  ;;  %v1053_v53 = vrot.slane %v1025_v47, %v4295_v8  ;;  %v1055_v54 = vcombine.high %v1039_v48, %v1039_v48  ;;  %v2324_v55 = vrot.slane %v1039_v48, %v4298_v10 }
  0x9b   : > { %v1081_v56 = vrot.slane %v1065_v18, %v4295_v8  ;;  %v3360_v57 = vcombine.low %v3352_v42, %v3359_v49  ;;  %v3362_v58 = vcombine.low %v2316_v46, %v2320_v50  ;;  %v3369_v59 = vrot.slane %v3361_v51, %v4300_v11 }
  0x9c   : > { %v1095_v60 = vrot.slane %v1073_v52, %v4295_v8  ;;  %v1057_v61 = vcombine.high %v1053_v53, %v1053_v53  ;;  %v2328_v62 = vrot.slane %v1053_v53, %v4298_v10  ;;  %v2332_v63 = vrot.slane %v1055_v54, %v4298_v10 }
  0x9d   : > { %v1103_v0 = vcombine.high %v1081_v56, %v1081_v56  ;;  %4029 = vst.msk [vmem:[%s4354_s17 + $0x1d8] sm:$0xff] %vm3969_vm0, %v3360_v57  ;;  %4033 = vst.msk [vmem:[%s4354_s17 + $0x1f8] sm:$0xff] %vm3969_vm0, %v3360_v57  ;;  %v3376_v1 = vrot.slane %v3362_v58, %v4300_v11  ;;  %v2340_v3 = vrot.slane %v1081_v56, %v4298_v10 }
  0x9e   : > { %v1105_v2 = vcombine.high %v1095_v60, %v1095_v60  ;;  %v2344_v4 = vrot.slane %v1095_v60, %v4298_v10  ;;  %v2336_v6 = vrot.slane %v1057_v61, %v4298_v10  ;;  %v3378_v7 = vcombine.low %v2324_v55, %v2328_v62 }
  0x9f   : > { %v2348_v9 = vrot.slane %v1103_v0, %v4298_v10  ;;  %v1058_v12 = vcombine.high %v178_v39, %v178_v39  ;;  %v3377_v14 = vcombine.low %v3369_v59, %v3376_v1  ;;  %v1114_v17 = vrot.slane %v179_v5, %v4295_v8 }
  0xa0   : > { %v2352_v15 = vrot.slane %v1105_v2, %v4298_v10  ;;  %v3395_v16 = vcombine.low %v2340_v3, %v2344_v4  ;;  %v3379_v19 = vcombine.low %v2332_v63, %v2336_v6  ;;  %v3386_v23 = vrot.slane %v3378_v7, %v4300_v11 }
  0xa1   : > { %v1072_v24 = vrot.slane %v1058_v12, %v4295_v8  ;;  %v1107_v25 = vcombine.high %v179_v5, %v179_v5  ;;  %4034 = vst.msk [vmem:[%s4354_s17 + $0x200] sm:$0xff] %vm3969_vm0, %v3377_v14  ;;  %4038 = vst.msk [vmem:[%s4354_s17 + $0x220] sm:$0xff] %vm3969_vm0, %v3377_v14  ;;  %v1122_v28 = vcombine.high %v1114_v17, %v1114_v17  ;;  %v181_v14 = vld [vmem:[%s4293_s13 + $0xa0] sm:$0xff] }
  0xa2   : > { %v3396_v26 = vcombine.low %v2348_v9, %v2352_v15  ;;  %v3403_v27 = vrot.slane %v3395_v16, %v4300_v11  ;;  %v1130_v29 = vrot.slane %v1114_v17, %v4295_v8  ;;  %v3393_v31 = vrot.slane %v3379_v19, %v4300_v11 }
  0xa3   : > { %v1074_v30 = vcombine.high %v1072_v24, %v1072_v24  ;;  %v1088_v32 = vrot.slane %v1072_v24, %v4295_v8  ;;  %v1121_v33 = vrot.slane %v1107_v25, %v4295_v8  ;;  %v1144_v35 = vrot.slane %v1122_v28, %v4295_v8 }
  0xa4   : > { %v3410_v34 = vrot.slane %v3396_v26, %v4300_v11  ;;  %v1152_v13 = vcombine.high %v1130_v29, %v1130_v29  ;;  %v2372_v20 = vrot.slane %v1130_v29, %v4298_v10  ;;  %v3394_v36 = vcombine.low %v3386_v23, %v3393_v31 }
  0xa5   : > { %v1102_v37 = vrot.slane %v1074_v30, %v4295_v8  ;;  %v1104_v38 = vcombine.high %v1088_v32, %v1088_v32  ;;  %v2356_v39 = vrot.slane %v1088_v32, %v4298_v10  ;;  %v1154_v21 = vcombine.high %v1144_v35, %v1144_v35 }
  0xa6   : > { %v3411_v40 = vcombine.low %v3403_v27, %v3410_v34  ;;  %v2376_v41 = vrot.slane %v1144_v35, %v4298_v10  ;;  %v2380_v18 = vrot.slane %v1152_v13, %v4298_v10  ;;  %4035 = vst.msk [vmem:[%s4354_s17 + $0x208] sm:$0xff] %vm3969_vm0, %v3394_v36  ;;  %4039 = vst.msk [vmem:[%s4354_s17 + $0x228] sm:$0xff] %vm3969_vm0, %v3394_v36 }
  0xa7   : > { %v1106_v42 = vcombine.high %v1102_v37, %v1102_v37  ;;  %v2360_v43 = vrot.slane %v1102_v37, %v4298_v10  ;;  %v2364_v44 = vrot.slane %v1104_v38, %v4298_v10  ;;  %v1123_v45 = vcombine.high %v1121_v33, %v1121_v33 }
  0xa8   : > { %4036 = vst.msk [vmem:[%s4354_s17 + $0x210] sm:$0xff] %vm3969_vm0, %v3411_v40  ;;  %4040 = vst.msk [vmem:[%s4354_s17 + $0x230] sm:$0xff] %vm3969_vm0, %v3411_v40  ;;  %v2384_v46 = vrot.slane %v1154_v21, %v4298_v10  ;;  %v3429_v47 = vcombine.low %v2372_v20, %v2376_v41  ;;  %v1137_v48 = vrot.slane %v1121_v33, %v4295_v8 }
  0xa9   : > { %v1163_v49 = vrot.slane %v180_v22, %v4295_v8  ;;  %v2368_v50 = vrot.slane %v1106_v42, %v4298_v10  ;;  %v3412_v51 = vcombine.low %v2356_v39, %v2360_v43  ;;  %v1151_v52 = vrot.slane %v1123_v45, %v4295_v8  ;;  %v182_v42 = vld [vmem:[%s4293_s13 + $0xa8] sm:$0xff] }
  0xaa   : > { %v1156_v53 = vcombine.high %v180_v22, %v180_v22  ;;  %v3430_v54 = vcombine.low %v2380_v18, %v2384_v46  ;;  %v3437_v55 = vrot.slane %v3429_v47, %v4300_v11  ;;  %v1153_v56 = vcombine.high %v1137_v48, %v1137_v48 }
  0xab   : > { %v2388_v57 = vrot.slane %v1137_v48, %v4298_v10  ;;  %v3413_v58 = vcombine.low %v2364_v44, %v2368_v50  ;;  %v3420_v59 = vrot.slane %v3412_v51, %v4300_v11  ;;  %v1155_v60 = vcombine.high %v1151_v52, %v1151_v52 }
  0xac   : > { %v2392_v61 = vrot.slane %v1151_v52, %v4298_v10  ;;  %v3444_v62 = vrot.slane %v3430_v54, %v4300_v11  ;;  %v2396_v63 = vrot.slane %v1153_v56, %v4298_v10  ;;  %v1171_v0 = vcombine.high %v1163_v49, %v1163_v49 }
  0xad   : > { %v1179_v1 = vrot.slane %v1163_v49, %v4295_v8  ;;  %v3427_v2 = vrot.slane %v3413_v58, %v4300_v11  ;;  %v2400_v3 = vrot.slane %v1155_v60, %v4298_v10  ;;  %v1170_v5 = vrot.slane %v1156_v53, %v4295_v8 }
  0xae   : > { %v3446_v4 = vcombine.low %v2388_v57, %v2392_v61  ;;  %v3445_v6 = vcombine.low %v3437_v55, %v3444_v62  ;;  %v1193_v7 = vrot.slane %v1171_v0, %v4295_v8  ;;  %v1212_v29 = vrot.slane %v181_v14, %v4295_v8 }
  0xaf   : > { %v1201_v9 = vcombine.high %v1179_v1, %v1179_v1  ;;  %v2404_v12 = vrot.slane %v1179_v1, %v4298_v10  ;;  %v3428_v15 = vcombine.low %v3420_v59, %v3427_v2  ;;  %v3447_v16 = vcombine.low %v2396_v63, %v2400_v3 }
  0xb0   : > { %v3454_v17 = vrot.slane %v3446_v4, %v4300_v11  ;;  %v1172_v19 = vcombine.high %v1170_v5, %v1170_v5  ;;  %4042 = vst.msk [vmem:[%s4354_s17 + $0x240] sm:$0xff] %vm3969_vm0, %v3445_v6  ;;  %4046 = vst.msk [vmem:[%s4354_s17 + $0x260] sm:$0xff] %vm3969_vm0, %v3445_v6  ;;  %v1203_v23 = vcombine.high %v1193_v7, %v1193_v7 }
  0xb1   : > { %v2408_v24 = vrot.slane %v1193_v7, %v4298_v10  ;;  %v2412_v25 = vrot.slane %v1201_v9, %v4298_v10  ;;  %v1186_v26 = vrot.slane %v1170_v5, %v4295_v8  ;;  %4037 = vst.msk [vmem:[%s4354_s17 + $0x218] sm:$0xff] %vm3969_vm0, %v3428_v15  ;;  %4041 = vst.msk [vmem:[%s4354_s17 + $0x238] sm:$0xff] %vm3969_vm0, %v3428_v15  ;;  %v183_v15 = vld [vmem:[%s4293_s13 + $0xb0] sm:$0xff] }
  0xb2   : > { %v3461_v27 = vrot.slane %v3447_v16, %v4300_v11  ;;  %v1200_v28 = vrot.slane %v1172_v19, %v4295_v8  ;;  %v1205_v31 = vcombine.high %v181_v14, %v181_v14  ;;  %v2416_v30 = vrot.slane %v1203_v23, %v4298_v10 }
  0xb3   : > { %v3463_v32 = vcombine.low %v2404_v12, %v2408_v24  ;;  %v1202_v33 = vcombine.high %v1186_v26, %v1186_v26  ;;  %v2420_v34 = vrot.slane %v1186_v26, %v4298_v10  ;;  %v1220_v36 = vcombine.high %v1212_v29, %v1212_v29 }
  0xb4   : > { %v3462_v35 = vcombine.low %v3454_v17, %v3461_v27  ;;  %v1204_v13 = vcombine.high %v1200_v28, %v1200_v28  ;;  %v2424_v20 = vrot.slane %v1200_v28, %v4298_v10  ;;  %v3464_v37 = vcombine.low %v2412_v25, %v2416_v30 }
  0xb5   : > { %v3471_v38 = vrot.slane %v3463_v32, %v4300_v11  ;;  %v2428_v39 = vrot.slane %v1202_v33, %v4298_v10  ;;  %v1228_v40 = vrot.slane %v1212_v29, %v4295_v8  ;;  %v1242_v18 = vrot.slane %v1220_v36, %v4295_v8 }
  0xb6   : > { %4043 = vst.msk [vmem:[%s4354_s17 + $0x248] sm:$0xff] %vm3969_vm0, %v3462_v35  ;;  %4047 = vst.msk [vmem:[%s4354_s17 + $0x268] sm:$0xff] %vm3969_vm0, %v3462_v35  ;;  %v2432_v21 = vrot.slane %v1204_v13, %v4298_v10  ;;  %v3480_v41 = vcombine.low %v2420_v34, %v2424_v20  ;;  %v1219_v22 = vrot.slane %v1205_v31, %v4295_v8 }
  0xb7   : > { %v3478_v43 = vrot.slane %v3464_v37, %v4300_v11  ;;  %v1250_v44 = vcombine.high %v1228_v40, %v1228_v40  ;;  %v2436_v45 = vrot.slane %v1228_v40, %v4298_v10  ;;  %v1261_v46 = vrot.slane %v182_v42, %v4295_v8 }
  0xb8   : > { %v3481_v47 = vcombine.low %v2428_v39, %v2432_v21  ;;  %v3488_v48 = vrot.slane %v3480_v41, %v4300_v11  ;;  %v1252_v49 = vcombine.high %v1242_v18, %v1242_v18  ;;  %v2440_v50 = vrot.slane %v1242_v18, %v4298_v10 }
  0xb9   : > { %v3479_v51 = vcombine.low %v3471_v38, %v3478_v43  ;;  %v2444_v52 = vrot.slane %v1250_v44, %v4298_v10  ;;  %v1221_v53 = vcombine.high %v1219_v22, %v1219_v22  ;;  %v1235_v54 = vrot.slane %v1219_v22, %v4295_v8 }
  0xba   : > { %v3495_v55 = vrot.slane %v3481_v47, %v4300_v11  ;;  %v2448_v56 = vrot.slane %v1252_v49, %v4298_v10  ;;  %v3497_v57 = vcombine.low %v2436_v45, %v2440_v50  ;;  %v1269_v58 = vcombine.high %v1261_v46, %v1261_v46  ;;  %v184_v47 = vld [vmem:[%s4293_s13 + $0xb8] sm:$0xff] }
  0xbb   : > { %4044 = vst.msk [vmem:[%s4354_s17 + $0x250] sm:$0xff] %vm3969_vm0, %v3479_v51  ;;  %4048 = vst.msk [vmem:[%s4354_s17 + $0x270] sm:$0xff] %vm3969_vm0, %v3479_v51  ;;  %v1249_v59 = vrot.slane %v1221_v53, %v4295_v8  ;;  %v1251_v60 = vcombine.high %v1235_v54, %v1235_v54  ;;  %v2452_v61 = vrot.slane %v1235_v54, %v4298_v10 }
  0xbc   : > { %v1277_v62 = vrot.slane %v1261_v46, %v4295_v8  ;;  %v3496_v63 = vcombine.low %v3488_v48, %v3495_v55  ;;  %v3498_v0 = vcombine.low %v2444_v52, %v2448_v56  ;;  %v3505_v1 = vrot.slane %v3497_v57, %v4300_v11 }
  0xbd   : > { %v1291_v2 = vrot.slane %v1269_v58, %v4295_v8  ;;  %v1253_v3 = vcombine.high %v1249_v59, %v1249_v59  ;;  %v2456_v4 = vrot.slane %v1249_v59, %v4298_v10  ;;  %v2460_v5 = vrot.slane %v1251_v60, %v4298_v10 }
  0xbe   : > { %v1299_v6 = vcombine.high %v1277_v62, %v1277_v62  ;;  %4045 = vst.msk [vmem:[%s4354_s17 + $0x258] sm:$0xff] %vm3969_vm0, %v3496_v63  ;;  %4049 = vst.msk [vmem:[%s4354_s17 + $0x278] sm:$0xff] %vm3969_vm0, %v3496_v63  ;;  %v3512_v7 = vrot.slane %v3498_v0, %v4300_v11  ;;  %v2468_v12 = vrot.slane %v1277_v62, %v4298_v10 }
  0xbf   : > { %v1301_v9 = vcombine.high %v1291_v2, %v1291_v2  ;;  %v2472_v14 = vrot.slane %v1291_v2, %v4298_v10  ;;  %v2464_v16 = vrot.slane %v1253_v3, %v4298_v10  ;;  %v3514_v17 = vcombine.low %v2452_v61, %v2456_v4 }
  0xc0   : > { %v2476_v19 = vrot.slane %v1299_v6, %v4298_v10  ;;  %v1254_v23 = vcombine.high %v182_v42, %v182_v42  ;;  %v3513_v24 = vcombine.low %v3505_v1, %v3512_v7  ;;  %v1310_v27 = vrot.slane %v183_v15, %v4295_v8 }
  0xc1   : > { %v2480_v25 = vrot.slane %v1301_v9, %v4298_v10  ;;  %v3531_v26 = vcombine.low %v2468_v12, %v2472_v14  ;;  %v3515_v28 = vcombine.low %v2460_v5, %v2464_v16  ;;  %v3522_v29 = vrot.slane %v3514_v17, %v4300_v11 }
  0xc2   : > { %v1268_v31 = vrot.slane %v1254_v23, %v4295_v8  ;;  %v1303_v30 = vcombine.high %v183_v15, %v183_v15  ;;  %4050 = vst.msk [vmem:[%s4354_s17 + $0x280] sm:$0xff] %vm3969_vm0, %v3513_v24  ;;  %4054 = vst.msk [vmem:[%s4354_s17 + $0x2a0] sm:$0xff] %vm3969_vm0, %v3513_v24  ;;  %v1318_v34 = vcombine.high %v1310_v27, %v1310_v27  ;;  %v185_v24 = vld [vmem:[%s4293_s13 + $0xc0] sm:$0xff] }
  0xc3   : > { %v3532_v32 = vcombine.low %v2476_v19, %v2480_v25  ;;  %v3539_v33 = vrot.slane %v3531_v26, %v4300_v11  ;;  %v1326_v35 = vrot.slane %v1310_v27, %v4295_v8  ;;  %v3529_v13 = vrot.slane %v3515_v28, %v4300_v11 }
  0xc4   : > { %v1270_v20 = vcombine.high %v1268_v31, %v1268_v31  ;;  %v1284_v36 = vrot.slane %v1268_v31, %v4295_v8  ;;  %v1317_v37 = vrot.slane %v1303_v30, %v4295_v8  ;;  %v1340_v39 = vrot.slane %v1318_v34, %v4295_v8 }
  0xc5   : > { %v3546_v38 = vrot.slane %v3532_v32, %v4300_v11  ;;  %v1348_v40 = vcombine.high %v1326_v35, %v1326_v35  ;;  %v2500_v21 = vrot.slane %v1326_v35, %v4298_v10  ;;  %v3530_v41 = vcombine.low %v3522_v29, %v3529_v13 }
  0xc6   : > { %v1298_v18 = vrot.slane %v1270_v20, %v4295_v8  ;;  %v1300_v22 = vcombine.high %v1284_v36, %v1284_v36  ;;  %v2484_v42 = vrot.slane %v1284_v36, %v4298_v10  ;;  %v1350_v44 = vcombine.high %v1340_v39, %v1340_v39 }
  0xc7   : > { %v3547_v43 = vcombine.low %v3539_v33, %v3546_v38  ;;  %v2504_v45 = vrot.slane %v1340_v39, %v4298_v10  ;;  %v2508_v46 = vrot.slane %v1348_v40, %v4298_v10  ;;  %4051 = vst.msk [vmem:[%s4354_s17 + $0x288] sm:$0xff] %vm3969_vm0, %v3530_v41  ;;  %4055 = vst.msk [vmem:[%s4354_s17 + $0x2a8] sm:$0xff] %vm3969_vm0, %v3530_v41 }
  0xc8   : > { %v1302_v48 = vcombine.high %v1298_v18, %v1298_v18  ;;  %v2488_v49 = vrot.slane %v1298_v18, %v4298_v10  ;;  %v2492_v50 = vrot.slane %v1300_v22, %v4298_v10  ;;  %v1319_v51 = vcombine.high %v1317_v37, %v1317_v37 }
  0xc9   : > { %4052 = vst.msk [vmem:[%s4354_s17 + $0x290] sm:$0xff] %vm3969_vm0, %v3547_v43  ;;  %4056 = vst.msk [vmem:[%s4354_s17 + $0x2b0] sm:$0xff] %vm3969_vm0, %v3547_v43  ;;  %v2512_v52 = vrot.slane %v1350_v44, %v4298_v10  ;;  %v3565_v53 = vcombine.low %v2500_v21, %v2504_v45  ;;  %v1333_v54 = vrot.slane %v1317_v37, %v4295_v8 }
  0xca   : > { %v1359_v55 = vrot.slane %v184_v47, %v4295_v8  ;;  %v2496_v56 = vrot.slane %v1302_v48, %v4298_v10  ;;  %v3548_v57 = vcombine.low %v2484_v42, %v2488_v49  ;;  %v1347_v58 = vrot.slane %v1319_v51, %v4295_v8  ;;  %v186_v48 = vld [vmem:[%s4293_s13 + $0xc8] sm:$0xff] }
  0xcb   : > { %v1352_v59 = vcombine.high %v184_v47, %v184_v47  ;;  %v3566_v60 = vcombine.low %v2508_v46, %v2512_v52  ;;  %v3573_v61 = vrot.slane %v3565_v53, %v4300_v11  ;;  %v1349_v62 = vcombine.high %v1333_v54, %v1333_v54 }
  0xcc   : > { %v2516_v63 = vrot.slane %v1333_v54, %v4298_v10  ;;  %v3549_v0 = vcombine.low %v2492_v50, %v2496_v56  ;;  %v3556_v1 = vrot.slane %v3548_v57, %v4300_v11  ;;  %v1351_v2 = vcombine.high %v1347_v58, %v1347_v58 }
  0xcd   : > { %v2520_v3 = vrot.slane %v1347_v58, %v4298_v10  ;;  %v3580_v4 = vrot.slane %v3566_v60, %v4300_v11  ;;  %v2524_v5 = vrot.slane %v1349_v62, %v4298_v10  ;;  %v1367_v6 = vcombine.high %v1359_v55, %v1359_v55 }
  0xce   : > { %v1375_v7 = vrot.slane %v1359_v55, %v4295_v8  ;;  %v3563_v9 = vrot.slane %v3549_v0, %v4300_v11  ;;  %v2528_v12 = vrot.slane %v1351_v2, %v4298_v10  ;;  %v1366_v15 = vrot.slane %v1352_v59, %v4295_v8 }
  0xcf   : > { %v3582_v14 = vcombine.low %v2516_v63, %v2520_v3  ;;  %v3581_v16 = vcombine.low %v3573_v61, %v3580_v4  ;;  %v1389_v17 = vrot.slane %v1367_v6, %v4295_v8  ;;  %v1408_v35 = vrot.slane %v185_v24, %v4295_v8 }
  0xd0   : > { %v1397_v19 = vcombine.high %v1375_v7, %v1375_v7  ;;  %v2532_v23 = vrot.slane %v1375_v7, %v4298_v10  ;;  %v3564_v25 = vcombine.low %v3556_v1, %v3563_v9  ;;  %v3583_v26 = vcombine.low %v2524_v5, %v2528_v12 }
  0xd1   : > { %v3590_v27 = vrot.slane %v3582_v14, %v4300_v11  ;;  %v1368_v28 = vcombine.high %v1366_v15, %v1366_v15  ;;  %4058 = vst.msk [vmem:[%s4354_s17 + $0x2c0] sm:$0xff] %vm3969_vm0, %v3581_v16  ;;  %4062 = vst.msk [vmem:[%s4354_s17 + $0x2e0] sm:$0xff] %vm3969_vm0, %v3581_v16  ;;  %v1399_v29 = vcombine.high %v1389_v17, %v1389_v17 }
  0xd2   : > { %v2536_v31 = vrot.slane %v1389_v17, %v4298_v10  ;;  %v2540_v30 = vrot.slane %v1397_v19, %v4298_v10  ;;  %v1382_v32 = vrot.slane %v1366_v15, %v4295_v8  ;;  %4053 = vst.msk [vmem:[%s4354_s17 + $0x298] sm:$0xff] %vm3969_vm0, %v3564_v25  ;;  %4057 = vst.msk [vmem:[%s4354_s17 + $0x2b8] sm:$0xff] %vm3969_vm0, %v3564_v25  ;;  %v187_v25 = vld [vmem:[%s4293_s13 + $0xd0] sm:$0xff] }
  0xd3   : > { %v3597_v33 = vrot.slane %v3583_v26, %v4300_v11  ;;  %v1396_v34 = vrot.slane %v1368_v28, %v4295_v8  ;;  %v1401_v13 = vcombine.high %v185_v24, %v185_v24  ;;  %v2544_v20 = vrot.slane %v1399_v29, %v4298_v10 }
  0xd4   : > { %v3599_v36 = vcombine.low %v2532_v23, %v2536_v31  ;;  %v1398_v37 = vcombine.high %v1382_v32, %v1382_v32  ;;  %v2548_v38 = vrot.slane %v1382_v32, %v4298_v10  ;;  %v1416_v41 = vcombine.high %v1408_v35, %v1408_v35 }
  0xd5   : > { %v3598_v39 = vcombine.low %v3590_v27, %v3597_v33  ;;  %v1400_v40 = vcombine.high %v1396_v34, %v1396_v34  ;;  %v2552_v21 = vrot.slane %v1396_v34, %v4298_v10  ;;  %v3600_v18 = vcombine.low %v2540_v30, %v2544_v20 }
  0xd6   : > { %v3607_v22 = vrot.slane %v3599_v36, %v4300_v11  ;;  %v2556_v42 = vrot.slane %v1398_v37, %v4298_v10  ;;  %v1424_v43 = vrot.slane %v1408_v35, %v4295_v8  ;;  %v1438_v46 = vrot.slane %v1416_v41, %v4295_v8 }
  0xd7   : > { %4059 = vst.msk [vmem:[%s4354_s17 + $0x2c8] sm:$0xff] %vm3969_vm0, %v3598_v39  ;;  %4063 = vst.msk [vmem:[%s4354_s17 + $0x2e8] sm:$0xff] %vm3969_vm0, %v3598_v39  ;;  %v2560_v44 = vrot.slane %v1400_v40, %v4298_v10  ;;  %v3616_v45 = vcombine.low %v2548_v38, %v2552_v21  ;;  %v1415_v47 = vrot.slane %v1401_v13, %v4295_v8 }
  0xd8   : > { %v3614_v49 = vrot.slane %v3600_v18, %v4300_v11  ;;  %v1446_v50 = vcombine.high %v1424_v43, %v1424_v43  ;;  %v2564_v51 = vrot.slane %v1424_v43, %v4298_v10  ;;  %v1457_v52 = vrot.slane %v186_v48, %v4295_v8 }
  0xd9   : > { %v3617_v53 = vcombine.low %v2556_v42, %v2560_v44  ;;  %v3624_v54 = vrot.slane %v3616_v45, %v4300_v11  ;;  %v1448_v55 = vcombine.high %v1438_v46, %v1438_v46  ;;  %v2568_v56 = vrot.slane %v1438_v46, %v4298_v10 }
  0xda   : > { %v3615_v57 = vcombine.low %v3607_v22, %v3614_v49  ;;  %v2572_v58 = vrot.slane %v1446_v50, %v4298_v10  ;;  %v1417_v59 = vcombine.high %v1415_v47, %v1415_v47  ;;  %v1431_v60 = vrot.slane %v1415_v47, %v4295_v8 }
  0xdb   : > { %v3631_v61 = vrot.slane %v3617_v53, %v4300_v11  ;;  %v2576_v62 = vrot.slane %v1448_v55, %v4298_v10  ;;  %v3633_v63 = vcombine.low %v2564_v51, %v2568_v56  ;;  %v1465_v0 = vcombine.high %v1457_v52, %v1457_v52  ;;  %v188_v53 = vld [vmem:[%s4293_s13 + $0xd8] sm:$0xff] }
  0xdc   : > { %4060 = vst.msk [vmem:[%s4354_s17 + $0x2d0] sm:$0xff] %vm3969_vm0, %v3615_v57  ;;  %4064 = vst.msk [vmem:[%s4354_s17 + $0x2f0] sm:$0xff] %vm3969_vm0, %v3615_v57  ;;  %v1445_v1 = vrot.slane %v1417_v59, %v4295_v8  ;;  %v1447_v2 = vcombine.high %v1431_v60, %v1431_v60  ;;  %v2580_v3 = vrot.slane %v1431_v60, %v4298_v10 }
  0xdd   : > { %v1473_v4 = vrot.slane %v1457_v52, %v4295_v8  ;;  %v3632_v5 = vcombine.low %v3624_v54, %v3631_v61  ;;  %v3634_v6 = vcombine.low %v2572_v58, %v2576_v62  ;;  %v3641_v7 = vrot.slane %v3633_v63, %v4300_v11 }
  0xde   : > { %v1487_v9 = vrot.slane %v1465_v0, %v4295_v8  ;;  %v1449_v12 = vcombine.high %v1445_v1, %v1445_v1  ;;  %v2584_v14 = vrot.slane %v1445_v1, %v4298_v10  ;;  %v2588_v15 = vrot.slane %v1447_v2, %v4298_v10 }
  0xdf   : > { %v1495_v16 = vcombine.high %v1473_v4, %v1473_v4  ;;  %4061 = vst.msk [vmem:[%s4354_s17 + $0x2d8] sm:$0xff] %vm3969_vm0, %v3632_v5  ;;  %4065 = vst.msk [vmem:[%s4354_s17 + $0x2f8] sm:$0xff] %vm3969_vm0, %v3632_v5  ;;  %v3648_v17 = vrot.slane %v3634_v6, %v4300_v11  ;;  %v2596_v23 = vrot.slane %v1473_v4, %v4298_v10 }
  0xe0   : > { %v1497_v19 = vcombine.high %v1487_v9, %v1487_v9  ;;  %v2600_v24 = vrot.slane %v1487_v9, %v4298_v10  ;;  %v2592_v26 = vrot.slane %v1449_v12, %v4298_v10  ;;  %v3650_v27 = vcombine.low %v2580_v3, %v2584_v14 }
  0xe1   : > { %v2604_v28 = vrot.slane %v1495_v16, %v4298_v10  ;;  %v1450_v29 = vcombine.high %v186_v48, %v186_v48  ;;  %v3649_v31 = vcombine.low %v3641_v7, %v3648_v17  ;;  %v1506_v33 = vrot.slane %v187_v25, %v4295_v8 }
  0xe2   : > { %v2608_v30 = vrot.slane %v1497_v19, %v4298_v10  ;;  %v3667_v32 = vcombine.low %v2596_v23, %v2600_v24  ;;  %v3651_v34 = vcombine.low %v2588_v15, %v2592_v26  ;;  %v3658_v35 = vrot.slane %v3650_v27, %v4300_v11 }
  0xe3   : > { %v1464_v13 = vrot.slane %v1450_v29, %v4295_v8  ;;  %v1499_v20 = vcombine.high %v187_v25, %v187_v25  ;;  %4066 = vst.msk [vmem:[%s4354_s17 + $0x300] sm:$0xff] %vm3969_vm0, %v3649_v31  ;;  %4070 = vst.msk [vmem:[%s4354_s17 + $0x320] sm:$0xff] %vm3969_vm0, %v3649_v31  ;;  %v1514_v38 = vcombine.high %v1506_v33, %v1506_v33  ;;  %v189_v31 = vld [vmem:[%s4293_s13 + $0xe0] sm:$0xff] }
  0xe4   : > { %v3668_v36 = vcombine.low %v2604_v28, %v2608_v30  ;;  %v3675_v37 = vrot.slane %v3667_v32, %v4300_v11  ;;  %v1522_v39 = vrot.slane %v1506_v33, %v4295_v8  ;;  %v3665_v40 = vrot.slane %v3651_v34, %v4300_v11 }
  0xe5   : > { %v1466_v21 = vcombine.high %v1464_v13, %v1464_v13  ;;  %v1480_v41 = vrot.slane %v1464_v13, %v4295_v8  ;;  %v1513_v18 = vrot.slane %v1499_v20, %v4295_v8  ;;  %v1536_v42 = vrot.slane %v1514_v38, %v4295_v8 }
  0xe6   : > { %v3682_v22 = vrot.slane %v3668_v36, %v4300_v11  ;;  %v1544_v43 = vcombine.high %v1522_v39, %v1522_v39  ;;  %v2628_v44 = vrot.slane %v1522_v39, %v4298_v10  ;;  %v3666_v45 = vcombine.low %v3658_v35, %v3665_v40 }
  0xe7   : > { %v1494_v46 = vrot.slane %v1466_v21, %v4295_v8  ;;  %v1496_v47 = vcombine.high %v1480_v41, %v1480_v41  ;;  %v2612_v48 = vrot.slane %v1480_v41, %v4298_v10  ;;  %v1546_v50 = vcombine.high %v1536_v42, %v1536_v42 }
  0xe8   : > { %v3683_v49 = vcombine.low %v3675_v37, %v3682_v22  ;;  %v2632_v51 = vrot.slane %v1536_v42, %v4298_v10  ;;  %v2636_v52 = vrot.slane %v1544_v43, %v4298_v10  ;;  %4067 = vst.msk [vmem:[%s4354_s17 + $0x308] sm:$0xff] %vm3969_vm0, %v3666_v45  ;;  %4071 = vst.msk [vmem:[%s4354_s17 + $0x328] sm:$0xff] %vm3969_vm0, %v3666_v45 }
  0xe9   : > { %v1498_v54 = vcombine.high %v1494_v46, %v1494_v46  ;;  %v2616_v55 = vrot.slane %v1494_v46, %v4298_v10  ;;  %v2620_v56 = vrot.slane %v1496_v47, %v4298_v10  ;;  %v1515_v57 = vcombine.high %v1513_v18, %v1513_v18 }
  0xea   : > { %4068 = vst.msk [vmem:[%s4354_s17 + $0x310] sm:$0xff] %vm3969_vm0, %v3683_v49  ;;  %4072 = vst.msk [vmem:[%s4354_s17 + $0x330] sm:$0xff] %vm3969_vm0, %v3683_v49  ;;  %v2640_v58 = vrot.slane %v1546_v50, %v4298_v10  ;;  %v3701_v59 = vcombine.low %v2628_v44, %v2632_v51  ;;  %v1529_v60 = vrot.slane %v1513_v18, %v4295_v8 }
  0xeb   : > { %v1555_v61 = vrot.slane %v188_v53, %v4295_v8  ;;  %v2624_v62 = vrot.slane %v1498_v54, %v4298_v10  ;;  %v3684_v63 = vcombine.low %v2612_v48, %v2616_v55  ;;  %v1543_v0 = vrot.slane %v1515_v57, %v4295_v8  ;;  %v190_v54 = vld [vmem:[%s4293_s13 + $0xe8] sm:$0xff] }
  0xec   : > { %v1548_v1 = vcombine.high %v188_v53, %v188_v53  ;;  %v3702_v2 = vcombine.low %v2636_v52, %v2640_v58  ;;  %v3709_v3 = vrot.slane %v3701_v59, %v4300_v11  ;;  %v1545_v4 = vcombine.high %v1529_v60, %v1529_v60 }
  0xed   : > { %v2644_v5 = vrot.slane %v1529_v60, %v4298_v10  ;;  %v3685_v6 = vcombine.low %v2620_v56, %v2624_v62  ;;  %v3692_v7 = vrot.slane %v3684_v63, %v4300_v11  ;;  %v1547_v9 = vcombine.high %v1543_v0, %v1543_v0 }
  0xee   : > { %v2648_v12 = vrot.slane %v1543_v0, %v4298_v10  ;;  %v3716_v14 = vrot.slane %v3702_v2, %v4300_v11  ;;  %v2652_v15 = vrot.slane %v1545_v4, %v4298_v10  ;;  %v1563_v16 = vcombine.high %v1555_v61, %v1555_v61 }
  0xef   : > { %v1571_v17 = vrot.slane %v1555_v61, %v4295_v8  ;;  %v3699_v19 = vrot.slane %v3685_v6, %v4300_v11  ;;  %v2656_v23 = vrot.slane %v1547_v9, %v4298_v10  ;;  %v1562_v25 = vrot.slane %v1548_v1, %v4295_v8 }
  0xf0   : > { %v3718_v24 = vcombine.low %v2644_v5, %v2648_v12  ;;  %v3717_v26 = vcombine.low %v3709_v3, %v3716_v14  ;;  %v1585_v27 = vrot.slane %v1563_v16, %v4295_v8  ;;  %v1604_v39 = vrot.slane %v189_v31, %v4295_v8 }
  0xf1   : > { %v1593_v28 = vcombine.high %v1571_v17, %v1571_v17  ;;  %v2660_v29 = vrot.slane %v1571_v17, %v4298_v10  ;;  %v3700_v30 = vcombine.low %v3692_v7, %v3699_v19  ;;  %v3719_v32 = vcombine.low %v2652_v15, %v2656_v23 }
  0xf2   : > { %v3726_v33 = vrot.slane %v3718_v24, %v4300_v11  ;;  %v1564_v34 = vcombine.high %v1562_v25, %v1562_v25  ;;  %4074 = vst.msk [vmem:[%s4354_s17 + $0x340] sm:$0xff] %vm3969_vm0, %v3717_v26  ;;  %4078 = vst.msk [vmem:[%s4354_s17 + $0x360] sm:$0xff] %vm3969_vm0, %v3717_v26  ;;  %v1595_v35 = vcombine.high %v1585_v27, %v1585_v27 }
  0xf3   : > { %v2664_v13 = vrot.slane %v1585_v27, %v4298_v10  ;;  %v2668_v20 = vrot.slane %v1593_v28, %v4298_v10  ;;  %v1578_v36 = vrot.slane %v1562_v25, %v4295_v8  ;;  %4069 = vst.msk [vmem:[%s4354_s17 + $0x318] sm:$0xff] %vm3969_vm0, %v3700_v30  ;;  %4073 = vst.msk [vmem:[%s4354_s17 + $0x338] sm:$0xff] %vm3969_vm0, %v3700_v30  ;;  %v191_v30 = vld [vmem:[%s4293_s13 + $0xf0] sm:$0xff] }
  0xf4   : > { %v3733_v37 = vrot.slane %v3719_v32, %v4300_v11  ;;  %v1592_v38 = vrot.slane %v1564_v34, %v4295_v8  ;;  %v1597_v40 = vcombine.high %v189_v31, %v189_v31  ;;  %v2672_v21 = vrot.slane %v1595_v35, %v4298_v10 }
  0xf5   : > { %v3735_v41 = vcombine.low %v2660_v29, %v2664_v13  ;;  %v1594_v18 = vcombine.high %v1578_v36, %v1578_v36  ;;  %v2676_v22 = vrot.slane %v1578_v36, %v4298_v10  ;;  %v1612_v45 = vcombine.high %v1604_v39, %v1604_v39 }
  0xf6   : > { %v3734_v42 = vcombine.low %v3726_v33, %v3733_v37  ;;  %v1596_v43 = vcombine.high %v1592_v38, %v1592_v38  ;;  %v2680_v44 = vrot.slane %v1592_v38, %v4298_v10  ;;  %v3736_v46 = vcombine.low %v2668_v20, %v2672_v21 }
  0xf7   : > { %v3743_v47 = vrot.slane %v3735_v41, %v4300_v11  ;;  %v2684_v48 = vrot.slane %v1594_v18, %v4298_v10  ;;  %v1620_v49 = vrot.slane %v1604_v39, %v4295_v8  ;;  %v1634_v52 = vrot.slane %v1612_v45, %v4295_v8 }
  0xf8   : > { %4075 = vst.msk [vmem:[%s4354_s17 + $0x348] sm:$0xff] %vm3969_vm0, %v3734_v42  ;;  %4079 = vst.msk [vmem:[%s4354_s17 + $0x368] sm:$0xff] %vm3969_vm0, %v3734_v42  ;;  %v2688_v50 = vrot.slane %v1596_v43, %v4298_v10  ;;  %v3752_v51 = vcombine.low %v2676_v22, %v2680_v44  ;;  %v1611_v53 = vrot.slane %v1597_v40, %v4295_v8 }
  0xf9   : > { %v3750_v55 = vrot.slane %v3736_v46, %v4300_v11  ;;  %v1642_v56 = vcombine.high %v1620_v49, %v1620_v49  ;;  %v2692_v57 = vrot.slane %v1620_v49, %v4298_v10  ;;  %v1653_v58 = vrot.slane %v190_v54, %v4295_v8 }
  0xfa   : > { %v3753_v59 = vcombine.low %v2684_v48, %v2688_v50  ;;  %v3760_v60 = vrot.slane %v3752_v51, %v4300_v11  ;;  %v1644_v61 = vcombine.high %v1634_v52, %v1634_v52  ;;  %v2696_v62 = vrot.slane %v1634_v52, %v4298_v10 }
  0xfb   : > { %v3751_v63 = vcombine.low %v3743_v47, %v3750_v55  ;;  %v2700_v0 = vrot.slane %v1642_v56, %v4298_v10  ;;  %v1613_v1 = vcombine.high %v1611_v53, %v1611_v53  ;;  %v1627_v2 = vrot.slane %v1611_v53, %v4295_v8 }
  0xfc   : > { %v3767_v3 = vrot.slane %v3753_v59, %v4300_v11  ;;  %v2704_v4 = vrot.slane %v1644_v61, %v4298_v10  ;;  %v3769_v5 = vcombine.low %v2692_v57, %v2696_v62  ;;  %v1661_v6 = vcombine.high %v1653_v58, %v1653_v58  ;;  %v192_v59 = vld [vmem:[%s4293_s13 + $0xf8] sm:$0xff] }
  0xfd   : > { %4076 = vst.msk [vmem:[%s4354_s17 + $0x350] sm:$0xff] %vm3969_vm0, %v3751_v63  ;;  %4080 = vst.msk [vmem:[%s4354_s17 + $0x370] sm:$0xff] %vm3969_vm0, %v3751_v63  ;;  %v1641_v7 = vrot.slane %v1613_v1, %v4295_v8  ;;  %v1643_v9 = vcombine.high %v1627_v2, %v1627_v2  ;;  %v2708_v12 = vrot.slane %v1627_v2, %v4298_v10 }
  0xfe   : > { %v1669_v14 = vrot.slane %v1653_v58, %v4295_v8  ;;  %v3768_v15 = vcombine.low %v3760_v60, %v3767_v3  ;;  %v3770_v16 = vcombine.low %v2700_v0, %v2704_v4  ;;  %v3777_v17 = vrot.slane %v3769_v5, %v4300_v11 }
  0xff   : > { %v1683_v19 = vrot.slane %v1661_v6, %v4295_v8  ;;  %v1645_v23 = vcombine.high %v1641_v7, %v1641_v7  ;;  %v2712_v24 = vrot.slane %v1641_v7, %v4298_v10  ;;  %v2716_v25 = vrot.slane %v1643_v9, %v4298_v10 }
 0x100   : > { %v1691_v26 = vcombine.high %v1669_v14, %v1669_v14  ;;  %4077 = vst.msk [vmem:[%s4354_s17 + $0x358] sm:$0xff] %vm3969_vm0, %v3768_v15  ;;  %4081 = vst.msk [vmem:[%s4354_s17 + $0x378] sm:$0xff] %vm3969_vm0, %v3768_v15  ;;  %v3784_v27 = vrot.slane %v3770_v16, %v4300_v11  ;;  %v2724_v29 = vrot.slane %v1669_v14, %v4298_v10 }
 0x101   : > { %v1693_v28 = vcombine.high %v1683_v19, %v1683_v19  ;;  %v2728_v31 = vrot.slane %v1683_v19, %v4298_v10  ;;  %v2720_v32 = vrot.slane %v1645_v23, %v4298_v10  ;;  %v3786_v33 = vcombine.low %v2708_v12, %v2712_v24 }
 0x102   : > { %v2732_v34 = vrot.slane %v1691_v26, %v4298_v10  ;;  %v1646_v35 = vcombine.high %v190_v54, %v190_v54  ;;  %v3785_v13 = vcombine.low %v3777_v17, %v3784_v27  ;;  %v1702_v37 = vrot.slane %v191_v30, %v4295_v8 }
 0x103   : > { %v2736_v20 = vrot.slane %v1693_v28, %v4298_v10  ;;  %v3803_v36 = vcombine.low %v2724_v29, %v2728_v31  ;;  %v3787_v38 = vcombine.low %v2716_v25, %v2720_v32  ;;  %v3794_v39 = vrot.slane %v3786_v33, %v4300_v11 }
 0x104   : > { %v1660_v40 = vrot.slane %v1646_v35, %v4295_v8  ;;  %v1695_v21 = vcombine.high %v191_v30, %v191_v30  ;;  %4082 = vst.msk [vmem:[%s4354_s17 + $0x380] sm:$0xff] %vm3969_vm0, %v3785_v13  ;;  %4086 = vst.msk [vmem:[%s4354_s17 + $0x3a0] sm:$0xff] %vm3969_vm0, %v3785_v13  ;;  %v1710_v22 = vcombine.high %v1702_v37, %v1702_v37 }
 0x105   : > { %v3804_v41 = vcombine.low %v2732_v34, %v2736_v20  ;;  %v3811_v18 = vrot.slane %v3803_v36, %v4300_v11  ;;  %v1718_v42 = vrot.slane %v1702_v37, %v4295_v8  ;;  %v3801_v43 = vrot.slane %v3787_v38, %v4300_v11 }
 0x106   : > { %v1662_v44 = vcombine.high %v1660_v40, %v1660_v40  ;;  %v1676_v45 = vrot.slane %v1660_v40, %v4295_v8  ;;  %v1709_v46 = vrot.slane %v1695_v21, %v4295_v8  ;;  %v1732_v48 = vrot.slane %v1710_v22, %v4295_v8 }
 0x107   : > { %v3818_v47 = vrot.slane %v3804_v41, %v4300_v11  ;;  %v1740_v49 = vcombine.high %v1718_v42, %v1718_v42  ;;  %v2756_v50 = vrot.slane %v1718_v42, %v4298_v10  ;;  %v3802_v51 = vcombine.low %v3794_v39, %v3801_v43 }
 0x108   : > { %v1690_v52 = vrot.slane %v1662_v44, %v4295_v8  ;;  %v1692_v53 = vcombine.high %v1676_v45, %v1676_v45  ;;  %v2740_v54 = vrot.slane %v1676_v45, %v4298_v10  ;;  %v1742_v56 = vcombine.high %v1732_v48, %v1732_v48 }
 0x109   : > { %v3819_v55 = vcombine.low %v3811_v18, %v3818_v47  ;;  %v2760_v57 = vrot.slane %v1732_v48, %v4298_v10  ;;  %v2764_v58 = vrot.slane %v1740_v49, %v4298_v10  ;;  %4083 = vst.msk [vmem:[%s4354_s17 + $0x388] sm:$0xff] %vm3969_vm0, %v3802_v51  ;;  %4087 = vst.msk [vmem:[%s4354_s17 + $0x3a8] sm:$0xff] %vm3969_vm0, %v3802_v51 }
 0x10a   : > { %v1694_v60 = vcombine.high %v1690_v52, %v1690_v52  ;;  %v2744_v61 = vrot.slane %v1690_v52, %v4298_v10  ;;  %v2748_v62 = vrot.slane %v1692_v53, %v4298_v10  ;;  %v1711_v63 = vcombine.high %v1709_v46, %v1709_v46 }
 0x10b   : > { %4084 = vst.msk [vmem:[%s4354_s17 + $0x390] sm:$0xff] %vm3969_vm0, %v3819_v55  ;;  %4088 = vst.msk [vmem:[%s4354_s17 + $0x3b0] sm:$0xff] %vm3969_vm0, %v3819_v55  ;;  %v2768_v0 = vrot.slane %v1742_v56, %v4298_v10  ;;  %v3837_v1 = vcombine.low %v2756_v50, %v2760_v57  ;;  %v1725_v2 = vrot.slane %v1709_v46, %v4295_v8 }
 0x10c   : > { %v1751_v3 = vrot.slane %v192_v59, %v4295_v8  ;;  %v2752_v4 = vrot.slane %v1694_v60, %v4298_v10  ;;  %v3820_v5 = vcombine.low %v2740_v54, %v2744_v61  ;;  %v1739_v6 = vrot.slane %v1711_v63, %v4295_v8 }
 0x10d   : > { %v1744_v7 = vcombine.high %v192_v59, %v192_v59  ;;  %v3838_v9 = vcombine.low %v2764_v58, %v2768_v0  ;;  %v3845_v12 = vrot.slane %v3837_v1, %v4300_v11  ;;  %v1741_v14 = vcombine.high %v1725_v2, %v1725_v2 }
 0x10e   : > { %v2772_v15 = vrot.slane %v1725_v2, %v4298_v10  ;;  %v3821_v16 = vcombine.low %v2748_v62, %v2752_v4  ;;  %v3828_v17 = vrot.slane %v3820_v5, %v4300_v11  ;;  %v1743_v19 = vcombine.high %v1739_v6, %v1739_v6 }
 0x10f   : > { %v2776_v23 = vrot.slane %v1739_v6, %v4298_v10  ;;  %v3852_v24 = vrot.slane %v3838_v9, %v4300_v11  ;;  %v2780_v25 = vrot.slane %v1741_v14, %v4298_v10  ;;  %v1759_v26 = vcombine.high %v1751_v3, %v1751_v3 }
 0x110   : > { %v1767_v27 = vrot.slane %v1751_v3, %v4295_v8  ;;  %v3835_v28 = vrot.slane %v3821_v16, %v4300_v11  ;;  %v2784_v29 = vrot.slane %v1743_v19, %v4298_v10  ;;  %v1758_v30 = vrot.slane %v1744_v7, %v4295_v8 }
 0x111   : > { %v3854_v31 = vcombine.low %v2772_v15, %v2776_v23  ;;  %v3853_v32 = vcombine.low %v3845_v12, %v3852_v24  ;;  %v1781_v33 = vrot.slane %v1759_v26, %v4295_v8 }
 0x112   : > { %v1789_v34 = vcombine.high %v1767_v27, %v1767_v27  ;;  %v2788_v35 = vrot.slane %v1767_v27, %v4298_v10  ;;  %v3836_v13 = vcombine.low %v3828_v17, %v3835_v28  ;;  %v3855_v20 = vcombine.low %v2780_v25, %v2784_v29 }
 0x113   : > { %v3862_v36 = vrot.slane %v3854_v31, %v4300_v11  ;;  %v1760_v37 = vcombine.high %v1758_v30, %v1758_v30  ;;  %4090 = vst.msk [vmem:[%s4354_s17 + $0x3c0] sm:$0xff] %vm3969_vm0, %v3853_v32  ;;  %4094 = vst.msk [vmem:[%s4354_s17 + $0x3e0] sm:$0xff] %vm3969_vm0, %v3853_v32  ;;  %v1791_v38 = vcombine.high %v1781_v33, %v1781_v33 }
 0x114   : > { %v2792_v39 = vrot.slane %v1781_v33, %v4298_v10  ;;  %v2796_v40 = vrot.slane %v1789_v34, %v4298_v10  ;;  %v1774_v21 = vrot.slane %v1758_v30, %v4295_v8  ;;  %4085 = vst.msk [vmem:[%s4354_s17 + $0x398] sm:$0xff] %vm3969_vm0, %v3836_v13  ;;  %4089 = vst.msk [vmem:[%s4354_s17 + $0x3b8] sm:$0xff] %vm3969_vm0, %v3836_v13 }
 0x115   : > { %v3869_v41 = vrot.slane %v3855_v20, %v4300_v11  ;;  %v1788_v18 = vrot.slane %v1760_v37, %v4295_v8  ;;  %v2800_v22 = vrot.slane %v1791_v38, %v4298_v10 }
 0x116   : > { %v3871_v42 = vcombine.low %v2788_v35, %v2792_v39  ;;  %v1790_v43 = vcombine.high %v1774_v21, %v1774_v21  ;;  %v2804_v44 = vrot.slane %v1774_v21, %v4298_v10 }
 0x117   : > { %v3870_v45 = vcombine.low %v3862_v36, %v3869_v41  ;;  %v1792_v46 = vcombine.high %v1788_v18, %v1788_v18  ;;  %v2808_v47 = vrot.slane %v1788_v18, %v4298_v10  ;;  %v3872_v48 = vcombine.low %v2796_v40, %v2800_v22 }
 0x118   : > { %v3879_v49 = vrot.slane %v3871_v42, %v4300_v11  ;;  %v2812_v50 = vrot.slane %v1790_v43, %v4298_v10 }
 0x119   : > { %4091 = vst.msk [vmem:[%s4354_s17 + $0x3c8] sm:$0xff] %vm3969_vm0, %v3870_v45  ;;  %4095 = vst.msk [vmem:[%s4354_s17 + $0x3e8] sm:$0xff] %vm3969_vm0, %v3870_v45  ;;  %v2816_v8 = vrot.slane %v1792_v46, %v4298_v10  ;;  %v3888_v51 = vcombine.low %v2804_v44, %v2808_v47  ;;  %v3886_v52 = vrot.slane %v3872_v48, %v4300_v11 }
 0x11b   : > { %v3889_v53 = vcombine.low %v2812_v50, %v2816_v8  ;;  %v3896_v54 = vrot.slane %v3888_v51, %v4300_v11  ;;  %v3887_v55 = vcombine.low %v3879_v49, %v3886_v52 }
 0x11d   : > { %v3903_v56 = vrot.slane %v3889_v53, %v4300_v11  ;;  %4092 = vst.msk [vmem:[%s4354_s17 + $0x3d0] sm:$0xff] %vm3969_vm0, %v3887_v55  ;;  %4096 = vst.msk [vmem:[%s4354_s17 + $0x3f0] sm:$0xff] %vm3969_vm0, %v3887_v55 }
 0x11f   : > { %v3904_v57 = vcombine.low %v3896_v54, %v3903_v56 }
 0x121   : > { %4093 = vst.msk [vmem:[%s4354_s17 + $0x3d8] sm:$0xff] %vm3969_vm0, %v3904_v57  ;;  %4097 = vst.msk [vmem:[%s4354_s17 + $0x3f8] sm:$0xff] %vm3969_vm0, %v3904_v57 }
 0x122 PF: > { %s11_s8 = sadd.s32 1, %s4255_s8   ;;  %s5208_s6 = smov %s4251_s7 }
 0x123   : > { %p8_p5 = scmp.ge.s32.totalorder %s11_s8, 4   ;;  %s5209_s7 = smov %s5211_s9 }
 0x125   :  { %10 = sbr.rel (!%p8_p5) target bundleno = 2 (0x2), region = 54 }

</bundles_post_ra>
